<compile_context>
chip_gen: v7x
topology: tpu7x:2x2x1
jax: 0.10.0
libtpu: 0.0.40
codegen_flags: <defaults>
</compile_context>

<pallas_src>
import numpy as np
import jax
import jax.numpy as jnp
from jax.experimental import pallas as pl
from jax.experimental.pallas import tpu as pltpu


def set_kernel_size(kernel_sizes):
    """Mirrors the PyTorch module: validate divisibility, sort descending."""
    sizes = np.asarray(kernel_sizes)
    max_size = int(np.max(sizes))
    for size in sizes:
        if max_size % int(size) != 0:
            raise ValueError(f"{max_size} is not a multiple of {int(size)}.")
    return [int(s) for s in np.sort(sizes)[::-1]]


def _round_up(x, m):
    return (x + m - 1) // m * m


def _make_kernel(taps, t_tile, n_t, rem):
    """taps: tuple of (x_row_offset, c_in, time_offset, weight_col_offset)."""
    t0_last = (n_t - 1) * t_tile
    has_partial = rem != t_tile

    def kernel(x_ref, w_ref, b_ref, o_ref):
        # x_ref: (1, C_total, L)   one batch element, full time axis (revisited)
        # w_ref: (C_out, K_total)  taps/scales stacked along the contraction
        # b_ref: (C_out, 1)
        # o_ref: (1, C_out, t_tile) lane-dense output tile (time on lanes)

        def tile_result(t_start, width):
            # One (C_out, width) output tile: sum of per-(scale, tap) GEMMs fed
            # straight from the resident x block -- no slab, no scratch stores;
            # the (idle) MXU absorbs the extra small matmuls.
            acc = None
            for c_off, c_in, t_off, col in taps:
                xs = x_ref[0, c_off:c_off + c_in, pl.ds(t_start + t_off, width)]
                part = jnp.dot(w_ref[:, col:col + c_in], xs,
                               preferred_element_type=jnp.float32)
                acc = part if acc is None else acc + part
            return (acc + b_ref[...]).astype(o_ref.dtype)

        if not has_partial:
            # Every tile is full width; all reads are in bounds by construction.
            t0 = pl.multiple_of(pl.program_id(1) * t_tile, t_tile)
            o_ref[0] = tile_result(t0, t_tile)
        elif n_t == 1:
            # Single (partial) tile: static in-bounds reads of width rem only.
            o_ref[0, :, :rem] = tile_result(0, rem)
        else:
            t = pl.program_id(1)

            @pl.when(t < n_t - 1)
            def _():
                t0 = pl.multiple_of(t * t_tile, t_tile)
                o_ref[0] = tile_result(t0, t_tile)

            @pl.when(t == n_t - 1)
            def _():
                # Partial tail tile: static, in-bounds reads of width rem; the
                # untouched lanes >= rem of this block are out of range of the
                # (B, C_out, T_out) output and are never written back.
                o_ref[0, :, :rem] = tile_result(t0_last, rem)

    return kernel


def sparse_multi_scale_conv(x_ncl, weights, bias, kernel_sizes, *,
                            t_tile=512, x_dtype=jnp.float32,
                            single_buffer_x=True):
    """Forward pass of SparseMultiScaleConv.

    x_ncl  : (B, sum(in_channels), L)
    weights: list, weights[i] has shape (C_out, in_channels[i], max//size_i),
             ordered like the descending-sorted kernel_sizes (as in the module).
    bias   : (1, C_out, 1) or None.
    Returns (B, C_out, L - max(kernel_sizes) + 1) float32.
    """
    kernel_sizes = set_kernel_size(kernel_sizes)          # sort, like the module
    B, c_total, L = (int(d) for d in x_ncl.shape)
    max_size = kernel_sizes[0]
    t_out = L - max_size + 1
    if t_out <= 0:
        raise ValueError("sequence length must exceed the largest kernel size")
    c_out = int(weights[0].shape[0])

    # Per-(scale, tap) specs + stacked weight columns (tap-major, channel-minor),
    # validated against the sorted kernel sizes so misaligned inputs fail loudly.
    taps = []
    w_cols = []
    c_off = 0
    col = 0
    for w, size in zip(weights, kernel_sizes):
        o, c_in, k_taps = (int(d) for d in w.shape)
        if o != c_out:
            raise ValueError("all scales must share out_channels")
        if k_taps != max_size // size:
            raise ValueError(
                f"weight tap count {k_taps} inconsistent with kernel size {size}; "
                f"weights must follow the descending-sorted kernel_sizes order")
        dil = size if k_taps > 1 else 1
        for j in range(k_taps):
            taps.append((c_off, c_in, j * dil, col + j * c_in))
        w_cols.append(jnp.transpose(jnp.asarray(w, jnp.float32), (0, 2, 1))
                      .reshape(c_out, k_taps * c_in))
        c_off += c_in
        col += k_taps * c_in
    if c_off != c_total:
        raise ValueError("sum of per-scale in_channels must equal X channel dim")
    k_total = col

    # Weights match the x dtype so the MXU gets its native path (bf16 on v6e/v7x)
    # and no per-piece casts are needed inside the kernel; accumulation is f32.
    w_dtype = jnp.bfloat16 if x_dtype == jnp.bfloat16 else jnp.float32
    w_stack = jnp.concatenate(w_cols, axis=1).astype(w_dtype)    # (C_out, K_total)
    if bias is None:
        bias_col = jnp.zeros((c_out, 1), jnp.float32)
    else:
        bias_col = jnp.asarray(bias, jnp.float32).reshape(c_out, 1)

    # No jnp.pad and no output slice: the only wrapper-side pass over x is the
    # optional bf16 cast (a no-op for the default f32 path).
    x_in = jnp.asarray(x_ncl, x_dtype)

    # Time tiling (lane axis).  Bigger tiles amortize the ~0.35us per-step cost;
    # the x block is independent of t_tile, so VMEM is dominated by
    # c_total * L * itemsize (single-buffered below).
    t_tile = max(128, _round_up(int(t_tile), 128))
    t_tile = min(t_tile, _round_up(t_out, 128))
    n_t = pl.cdiv(t_out, t_tile)
    rem = t_out - (n_t - 1) * t_tile        # width of the last (maybe partial) tile

    kernel = _make_kernel(tuple(taps), t_tile, n_t, rem)

    x_bytes = int(jnp.dtype(x_dtype).itemsize)
    w_bytes = int(jnp.dtype(w_dtype).itemsize)
    n_x_buf = 1 if single_buffer_x else 2
    vmem_est = (n_x_buf * c_total * L * x_bytes
                + 2 * (c_out * k_total * w_bytes + c_out * 4)
                + 2 * c_out * t_tile * 4)
    vmem_limit = int(min(max(2 * vmem_est, 32 * 1024 * 1024), 100 * 1024 * 1024))

    cost = pl.CostEstimate(
        flops=2 * B * c_out * k_total * t_out,
        transcendentals=0,
        bytes_accessed=(B * c_total * L * x_bytes
                        + c_out * k_total * w_bytes + c_out * 4
                        + B * c_out * t_out * 4))

    # Megacore: shard on batch only (keeps the per-batch x block fetched once per
    # core on v7x); if there is a single batch element, let time go parallel.
    dims = ("parallel", "parallel") if B == 1 else ("parallel", "arbitrary")

    x_index_map = lambda b, t: (b, 0, 0)           # constant across time tiles

    def _run(x_spec):
        return pl.pallas_call(
            kernel,
            out_shape=jax.ShapeDtypeStruct((B, c_out, t_out), jnp.float32),
            grid=(B, n_t),
            in_specs=[
                x_spec,
                pl.BlockSpec((c_out, k_total), lambda b, t: (0, 0)),
                pl.BlockSpec((c_out, 1), lambda b, t: (0, 0)),
            ],
            out_specs=pl.BlockSpec((1, c_out, t_tile), lambda b, t: (b, 0, t)),
            compiler_params=pltpu.CompilerParams(
                dimension_semantics=dims, vmem_limit_bytes=vmem_limit),
            cost_estimate=cost,
        )(x_in, w_stack, bias_col)

    if single_buffer_x:
        # The x block index never changes across the time axis, so a single VMEM
        # buffer suffices; double-buffering it only doubles the largest VMEM
        # allocation.  Fall back gracefully if this jax build rejects it.
        try:
            return _run(pl.BlockSpec((1, c_total, L), x_index_map,
                                     pipeline_mode=pl.Buffered(1)))
        except Exception:
            pass
    return _run(pl.BlockSpec((1, c_total, L), x_index_map))


def reference_multi_scale_conv(x_ncl, weights, bias, kernel_sizes):
    """Pure-JAX reference using lax.conv_general_dilated (cross-correlation)."""
    kernel_sizes = set_kernel_size(kernel_sizes)
    L = x_ncl.shape[-1]
    total = None
    c_off = 0
    for w, size in zip(weights, kernel_sizes):
        c_in, k_taps = int(w.shape[1]), int(w.shape[2])
        dil = size if k_taps > 1 else 1
        xi = x_ncl[:, c_off:c_off + c_in, : L - size + 1]
        c_off += c_in
        o = jax.lax.conv_general_dilated(
            xi, w, window_strides=(1,), padding="VALID",
            rhs_dilation=(dil,), dimension_numbers=("NCH", "OIH", "NCH"),
            precision=jax.lax.Precision.HIGHEST)
        total = o if total is None else total + o
    if bias is not None:
        total = total + bias
    return total


if __name__ == "__main__":
    key = jax.random.PRNGKey(0)

    # Small shapes consistent with the module defaults.
    B = 2
    out_channels = 8
    kernel_sizes = [16, 128, 32, 64]              # module default set (unsorted on purpose)
    sorted_sizes = set_kernel_size(kernel_sizes)  # -> [128, 64, 32, 16]
    in_channels = [4, 4, 4, 4]                    # aligned with the sorted sizes, as in the module
    max_size = sorted_sizes[0]
    L = 400

    # Deterministic 'gaussian' parameter init (matches __init__ shapes).
    weights = []
    for i, size in enumerate(sorted_sizes):
        k_taps = max_size // size
        key, wk = jax.random.split(key)
        weights.append(jax.random.normal(
            wk, (out_channels, in_channels[i], int(k_taps)), dtype=jnp.float32))
    key, bk = jax.random.split(key)
    bias = jax.random.normal(bk, (1, out_channels, 1), dtype=jnp.float32)

    key, xk = jax.random.split(key)
    x = jax.random.normal(xk, (B, sum(in_channels), L), dtype=jnp.float32)

    ref = jax.block_until_ready(
        reference_multi_scale_conv(x, weights, bias, kernel_sizes))

    # Default tiling: single 384-wide tile per batch element (exercises the
    # n_t == 1 partial-tile path; exact (B, C_out, T_out) output, no x padding).
    out = jax.block_until_ready(
        sparse_multi_scale_conv(x, weights, bias, kernel_sizes))
    assert out.shape == (B, out_channels, L - max_size + 1), out.shape
    np.testing.assert_allclose(np.asarray(out), np.asarray(ref),
                               rtol=2e-4, atol=2e-4)

    # Forced small tile: exercises the multi-tile path plus the in-kernel
    # partial-tail branch.  (Perf runs should keep the larger default tile.)
    out_small = jax.block_until_ready(
        sparse_multi_scale_conv(x, weights, bias, kernel_sizes, t_tile=128))
    np.testing.assert_allclose(np.asarray(out_small), np.asarray(ref),
                               rtol=2e-4, atol=2e-4)

    print("KERNEL_OK")
</pallas_src>

<mosaic_0001>
module attributes {stable_mosaic.version = 11 : i64} {
  func.func @kernel(%arg0: i32, %arg1: i32, %arg2: memref<1x16x400xf32, #tpu.memory_space<vmem>>, %arg3: memref<8x60xf32, #tpu.memory_space<vmem>>, %arg4: memref<8x1xf32, #tpu.memory_space<vmem>>, %arg5: memref<1x8x384xf32, #tpu.memory_space<vmem>>) attributes {dimension_semantics = [#tpu.dimension_semantics<parallel>, #tpu.dimension_semantics<arbitrary>], iteration_bounds = array<i64: 2, 1>, scalar_prefetch = 0 : i64, scratch_operands = 0 : i64, tpu.core_type = #tpu.core_type<tc>, window_params = [{pipeline_mode = #tpu.pipeline_mode<synchronous>, transform_indices = @transform_0, window_bounds = array<i64: 1, 16, 400>}, {pipeline_mode = #tpu.pipeline_mode<synchronous>, transform_indices = @transform_1, window_bounds = array<i64: 8, 60>}, {pipeline_mode = #tpu.pipeline_mode<synchronous>, transform_indices = @transform_2, window_bounds = array<i64: 8, 1>}, {transform_indices = @transform_3, window_bounds = array<i64: 1, 8, 384>}]} {
    %c0 = arith.constant 0 : index
    %c0_0 = arith.constant 0 : index
    %c0_1 = arith.constant 0 : index
    %0 = vector.load %arg2[%c0, %c0_0, %c0_1] : memref<1x16x400xf32, #tpu.memory_space<vmem>>, vector<1x4x273xf32>
    %1 = vector.shape_cast %0 : vector<1x4x273xf32> to vector<4x273xf32>
    %c0_2 = arith.constant 0 : index
    %c0_3 = arith.constant 0 : index
    %2 = vector.load %arg3[%c0_2, %c0_3] : memref<8x60xf32, #tpu.memory_space<vmem>>, vector<8x4xf32>
    %cst = arith.constant dense<0.000000e+00> : vector<8x273xf32>
    %3 = tpu.matmul %2, %1, %cst {dimension_numbers = #tpu.dot_dimension_numbers<[1], [0], [0], [1], [0, 0, 1, 1], [], []>} : vector<8x4xf32>, vector<4x273xf32>, vector<8x273xf32> -> vector<8x273xf32>
    %c0_4 = arith.constant 0 : index
    %c4 = arith.constant 4 : index
    %c0_5 = arith.constant 0 : index
    %4 = vector.load %arg2[%c0_4, %c4, %c0_5] : memref<1x16x400xf32, #tpu.memory_space<vmem>>, vector<1x4x273xf32>
    %5 = vector.shape_cast %4 : vector<1x4x273xf32> to vector<4x273xf32>
    %c0_6 = arith.constant 0 : index
    %c4_7 = arith.constant 4 : index
    %6 = vector.load %arg3[%c0_6, %c4_7] : memref<8x60xf32, #tpu.memory_space<vmem>>, vector<8x4xf32>
    %cst_8 = arith.constant dense<0.000000e+00> : vector<8x273xf32>
    %7 = tpu.matmul %6, %5, %cst_8 {dimension_numbers = #tpu.dot_dimension_numbers<[1], [0], [0], [1], [0, 0, 1, 1], [], []>} : vector<8x4xf32>, vector<4x273xf32>, vector<8x273xf32> -> vector<8x273xf32>
    %8 = arith.addf %3, %7 : vector<8x273xf32>
    %c0_9 = arith.constant 0 : index
    %c4_10 = arith.constant 4 : index
    %c64 = arith.constant 64 : index
    %9 = vector.load %arg2[%c0_9, %c4_10, %c64] : memref<1x16x400xf32, #tpu.memory_space<vmem>>, vector<1x4x273xf32>
    %10 = vector.shape_cast %9 : vector<1x4x273xf32> to vector<4x273xf32>
    %c0_11 = arith.constant 0 : index
    %c8 = arith.constant 8 : index
    %11 = vector.load %arg3[%c0_11, %c8] : memref<8x60xf32, #tpu.memory_space<vmem>>, vector<8x4xf32>
    %cst_12 = arith.constant dense<0.000000e+00> : vector<8x273xf32>
    %12 = tpu.matmul %11, %10, %cst_12 {dimension_numbers = #tpu.dot_dimension_numbers<[1], [0], [0], [1], [0, 0, 1, 1], [], []>} : vector<8x4xf32>, vector<4x273xf32>, vector<8x273xf32> -> vector<8x273xf32>
    %13 = arith.addf %8, %12 : vector<8x273xf32>
    %c0_13 = arith.constant 0 : index
    %c8_14 = arith.constant 8 : index
    %c0_15 = arith.constant 0 : index
    %14 = vector.load %arg2[%c0_13, %c8_14, %c0_15] : memref<1x16x400xf32, #tpu.memory_space<vmem>>, vector<1x4x273xf32>
    %15 = vector.shape_cast %14 : vector<1x4x273xf32> to vector<4x273xf32>
    %c0_16 = arith.constant 0 : index
    %c12 = arith.constant 12 : index
    %16 = vector.load %arg3[%c0_16, %c12] : memref<8x60xf32, #tpu.memory_space<vmem>>, vector<8x4xf32>
    %cst_17 = arith.constant dense<0.000000e+00> : vector<8x273xf32>
    %17 = tpu.matmul %16, %15, %cst_17 {dimension_numbers = #tpu.dot_dimension_numbers<[1], [0], [0], [1], [0, 0, 1, 1], [], []>} : vector<8x4xf32>, vector<4x273xf32>, vector<8x273xf32> -> vector<8x273xf32>
    %18 = arith.addf %13, %17 : vector<8x273xf32>
    %c0_18 = arith.constant 0 : index
    %c8_19 = arith.constant 8 : index
    %c32 = arith.constant 32 : index
    %19 = vector.load %arg2[%c0_18, %c8_19, %c32] : memref<1x16x400xf32, #tpu.memory_space<vmem>>, vector<1x4x273xf32>
    %20 = vector.shape_cast %19 : vector<1x4x273xf32> to vector<4x273xf32>
    %c0_20 = arith.constant 0 : index
    %c16 = arith.constant 16 : index
    %21 = vector.load %arg3[%c0_20, %c16] : memref<8x60xf32, #tpu.memory_space<vmem>>, vector<8x4xf32>
    %cst_21 = arith.constant dense<0.000000e+00> : vector<8x273xf32>
    %22 = tpu.matmul %21, %20, %cst_21 {dimension_numbers = #tpu.dot_dimension_numbers<[1], [0], [0], [1], [0, 0, 1, 1], [], []>} : vector<8x4xf32>, vector<4x273xf32>, vector<8x273xf32> -> vector<8x273xf32>
    %23 = arith.addf %18, %22 : vector<8x273xf32>
    %c0_22 = arith.constant 0 : index
    %c8_23 = arith.constant 8 : index
    %c64_24 = arith.constant 64 : index
    %24 = vector.load %arg2[%c0_22, %c8_23, %c64_24] : memref<1x16x400xf32, #tpu.memory_space<vmem>>, vector<1x4x273xf32>
    %25 = vector.shape_cast %24 : vector<1x4x273xf32> to vector<4x273xf32>
    %c0_25 = arith.constant 0 : index
    %c20 = arith.constant 20 : index
    %26 = vector.load %arg3[%c0_25, %c20] : memref<8x60xf32, #tpu.memory_space<vmem>>, vector<8x4xf32>
    %cst_26 = arith.constant dense<0.000000e+00> : vector<8x273xf32>
    %27 = tpu.matmul %26, %25, %cst_26 {dimension_numbers = #tpu.dot_dimension_numbers<[1], [0], [0], [1], [0, 0, 1, 1], [], []>} : vector<8x4xf32>, vector<4x273xf32>, vector<8x273xf32> -> vector<8x273xf32>
    %28 = arith.addf %23, %27 : vector<8x273xf32>
    %c0_27 = arith.constant 0 : index
    %c8_28 = arith.constant 8 : index
    %c96 = arith.constant 96 : index
    %29 = vector.load %arg2[%c0_27, %c8_28, %c96] : memref<1x16x400xf32, #tpu.memory_space<vmem>>, vector<1x4x273xf32>
    %30 = vector.shape_cast %29 : vector<1x4x273xf32> to vector<4x273xf32>
    %c0_29 = arith.constant 0 : index
    %c24 = arith.constant 24 : index
    %31 = vector.load %arg3[%c0_29, %c24] : memref<8x60xf32, #tpu.memory_space<vmem>>, vector<8x4xf32>
    %cst_30 = arith.constant dense<0.000000e+00> : vector<8x273xf32>
    %32 = tpu.matmul %31, %30, %cst_30 {dimension_numbers = #tpu.dot_dimension_numbers<[1], [0], [0], [1], [0, 0, 1, 1], [], []>} : vector<8x4xf32>, vector<4x273xf32>, vector<8x273xf32> -> vector<8x273xf32>
    %33 = arith.addf %28, %32 : vector<8x273xf32>
    %c0_31 = arith.constant 0 : index
    %c12_32 = arith.constant 12 : index
    %c0_33 = arith.constant 0 : index
    %34 = vector.load %arg2[%c0_31, %c12_32, %c0_33] : memref<1x16x400xf32, #tpu.memory_space<vmem>>, vector<1x4x273xf32>
    %35 = vector.shape_cast %34 : vector<1x4x273xf32> to vector<4x273xf32>
    %c0_34 = arith.constant 0 : index
    %c28 = arith.constant 28 : index
    %36 = vector.load %arg3[%c0_34, %c28] : memref<8x60xf32, #tpu.memory_space<vmem>>, vector<8x4xf32>
    %cst_35 = arith.constant dense<0.000000e+00> : vector<8x273xf32>
    %37 = tpu.matmul %36, %35, %cst_35 {dimension_numbers = #tpu.dot_dimension_numbers<[1], [0], [0], [1], [0, 0, 1, 1], [], []>} : vector<8x4xf32>, vector<4x273xf32>, vector<8x273xf32> -> vector<8x273xf32>
    %38 = arith.addf %33, %37 : vector<8x273xf32>
    %c0_36 = arith.constant 0 : index
    %c12_37 = arith.constant 12 : index
    %c16_38 = arith.constant 16 : index
    %39 = vector.load %arg2[%c0_36, %c12_37, %c16_38] : memref<1x16x400xf32, #tpu.memory_space<vmem>>, vector<1x4x273xf32>
    %40 = vector.shape_cast %39 : vector<1x4x273xf32> to vector<4x273xf32>
    %c0_39 = arith.constant 0 : index
    %c32_40 = arith.constant 32 : index
    %41 = vector.load %arg3[%c0_39, %c32_40] : memref<8x60xf32, #tpu.memory_space<vmem>>, vector<8x4xf32>
    %cst_41 = arith.constant dense<0.000000e+00> : vector<8x273xf32>
    %42 = tpu.matmul %41, %40, %cst_41 {dimension_numbers = #tpu.dot_dimension_numbers<[1], [0], [0], [1], [0, 0, 1, 1], [], []>} : vector<8x4xf32>, vector<4x273xf32>, vector<8x273xf32> -> vector<8x273xf32>
    %43 = arith.addf %38, %42 : vector<8x273xf32>
    %c0_42 = arith.constant 0 : index
    %c12_43 = arith.constant 12 : index
    %c32_44 = arith.constant 32 : index
    %44 = vector.load %arg2[%c0_42, %c12_43, %c32_44] : memref<1x16x400xf32, #tpu.memory_space<vmem>>, vector<1x4x273xf32>
    %45 = vector.shape_cast %44 : vector<1x4x273xf32> to vector<4x273xf32>
    %c0_45 = arith.constant 0 : index
    %c36 = arith.constant 36 : index
    %46 = vector.load %arg3[%c0_45, %c36] : memref<8x60xf32, #tpu.memory_space<vmem>>, vector<8x4xf32>
    %cst_46 = arith.constant dense<0.000000e+00> : vector<8x273xf32>
    %47 = tpu.matmul %46, %45, %cst_46 {dimension_numbers = #tpu.dot_dimension_numbers<[1], [0], [0], [1], [0, 0, 1, 1], [], []>} : vector<8x4xf32>, vector<4x273xf32>, vector<8x273xf32> -> vector<8x273xf32>
    %48 = arith.addf %43, %47 : vector<8x273xf32>
    %c0_47 = arith.constant 0 : index
    %c12_48 = arith.constant 12 : index
    %c48 = arith.constant 48 : index
    %49 = vector.load %arg2[%c0_47, %c12_48, %c48] : memref<1x16x400xf32, #tpu.memory_space<vmem>>, vector<1x4x273xf32>
    %50 = vector.shape_cast %49 : vector<1x4x273xf32> to vector<4x273xf32>
    %c0_49 = arith.constant 0 : index
    %c40 = arith.constant 40 : index
    %51 = vector.load %arg3[%c0_49, %c40] : memref<8x60xf32, #tpu.memory_space<vmem>>, vector<8x4xf32>
    %cst_50 = arith.constant dense<0.000000e+00> : vector<8x273xf32>
    %52 = tpu.matmul %51, %50, %cst_50 {dimension_numbers = #tpu.dot_dimension_numbers<[1], [0], [0], [1], [0, 0, 1, 1], [], []>} : vector<8x4xf32>, vector<4x273xf32>, vector<8x273xf32> -> vector<8x273xf32>
    %53 = arith.addf %48, %52 : vector<8x273xf32>
    %c0_51 = arith.constant 0 : index
    %c12_52 = arith.constant 12 : index
    %c64_53 = arith.constant 64 : index
    %54 = vector.load %arg2[%c0_51, %c12_52, %c64_53] : memref<1x16x400xf32, #tpu.memory_space<vmem>>, vector<1x4x273xf32>
    %55 = vector.shape_cast %54 : vector<1x4x273xf32> to vector<4x273xf32>
    %c0_54 = arith.constant 0 : index
    %c44 = arith.constant 44 : index
    %56 = vector.load %arg3[%c0_54, %c44] : memref<8x60xf32, #tpu.memory_space<vmem>>, vector<8x4xf32>
    %cst_55 = arith.constant dense<0.000000e+00> : vector<8x273xf32>
    %57 = tpu.matmul %56, %55, %cst_55 {dimension_numbers = #tpu.dot_dimension_numbers<[1], [0], [0], [1], [0, 0, 1, 1], [], []>} : vector<8x4xf32>, vector<4x273xf32>, vector<8x273xf32> -> vector<8x273xf32>
    %58 = arith.addf %53, %57 : vector<8x273xf32>
    %c0_56 = arith.constant 0 : index
    %c12_57 = arith.constant 12 : index
    %c80 = arith.constant 80 : index
    %59 = vector.load %arg2[%c0_56, %c12_57, %c80] : memref<1x16x400xf32, #tpu.memory_space<vmem>>, vector<1x4x273xf32>
    %60 = vector.shape_cast %59 : vector<1x4x273xf32> to vector<4x273xf32>
    %c0_58 = arith.constant 0 : index
    %c48_59 = arith.constant 48 : index
    %61 = vector.load %arg3[%c0_58, %c48_59] : memref<8x60xf32, #tpu.memory_space<vmem>>, vector<8x4xf32>
    %cst_60 = arith.constant dense<0.000000e+00> : vector<8x273xf32>
    %62 = tpu.matmul %61, %60, %cst_60 {dimension_numbers = #tpu.dot_dimension_numbers<[1], [0], [0], [1], [0, 0, 1, 1], [], []>} : vector<8x4xf32>, vector<4x273xf32>, vector<8x273xf32> -> vector<8x273xf32>
    %63 = arith.addf %58, %62 : vector<8x273xf32>
    %c0_61 = arith.constant 0 : index
    %c12_62 = arith.constant 12 : index
    %c96_63 = arith.constant 96 : index
    %64 = vector.load %arg2[%c0_61, %c12_62, %c96_63] : memref<1x16x400xf32, #tpu.memory_space<vmem>>, vector<1x4x273xf32>
    %65 = vector.shape_cast %64 : vector<1x4x273xf32> to vector<4x273xf32>
    %c0_64 = arith.constant 0 : index
    %c52 = arith.constant 52 : index
    %66 = vector.load %arg3[%c0_64, %c52] : memref<8x60xf32, #tpu.memory_space<vmem>>, vector<8x4xf32>
    %cst_65 = arith.constant dense<0.000000e+00> : vector<8x273xf32>
    %67 = tpu.matmul %66, %65, %cst_65 {dimension_numbers = #tpu.dot_dimension_numbers<[1], [0], [0], [1], [0, 0, 1, 1], [], []>} : vector<8x4xf32>, vector<4x273xf32>, vector<8x273xf32> -> vector<8x273xf32>
    %68 = arith.addf %63, %67 : vector<8x273xf32>
    %c0_66 = arith.constant 0 : index
    %c12_67 = arith.constant 12 : index
    %c112 = arith.constant 112 : index
    %69 = vector.load %arg2[%c0_66, %c12_67, %c112] : memref<1x16x400xf32, #tpu.memory_space<vmem>>, vector<1x4x273xf32>
    %70 = vector.shape_cast %69 : vector<1x4x273xf32> to vector<4x273xf32>
    %c0_68 = arith.constant 0 : index
    %c56 = arith.constant 56 : index
    %71 = vector.load %arg3[%c0_68, %c56] : memref<8x60xf32, #tpu.memory_space<vmem>>, vector<8x4xf32>
    %cst_69 = arith.constant dense<0.000000e+00> : vector<8x273xf32>
    %72 = tpu.matmul %71, %70, %cst_69 {dimension_numbers = #tpu.dot_dimension_numbers<[1], [0], [0], [1], [0, 0, 1, 1], [], []>} : vector<8x4xf32>, vector<4x273xf32>, vector<8x273xf32> -> vector<8x273xf32>
    %73 = arith.addf %68, %72 : vector<8x273xf32>
    %c0_70 = arith.constant 0 : index
    %c0_71 = arith.constant 0 : index
    %74 = vector.load %arg4[%c0_70, %c0_71] : memref<8x1xf32, #tpu.memory_space<vmem>>, vector<8x1xf32>
    %75 = vector.broadcast %74 : vector<8x1xf32> to vector<8x273xf32>
    %76 = arith.addf %73, %75 : vector<8x273xf32>
    %c0_72 = arith.constant 0 : index
    %c0_73 = arith.constant 0 : index
    %c0_74 = arith.constant 0 : index
    %77 = vector.load %arg5[%c0_72, %c0_73, %c0_74] : memref<1x8x384xf32, #tpu.memory_space<vmem>>, vector<1x8x273xf32>
    %78 = vector.shape_cast %77 : vector<1x8x273xf32> to vector<8x273xf32>
    %79 = vector.shape_cast %76 : vector<8x273xf32> to vector<1x8x273xf32>
    tpu.vector_store %arg5[%c0_72, %c0_73, %c0_74], %79 {strides = array<i32>} : memref<1x8x384xf32, #tpu.memory_space<vmem>>, vector<1x8x273xf32>,
    return
  }
  func.func @transform_0(%arg0: i32, %arg1: i32) -> (i32, i32, i32) {
    %c0_i32 = arith.constant 0 : i32
    %c0_i32_0 = arith.constant 0 : i32
    %c0_i32_1 = arith.constant 0 : i32
    return %arg0, %c0_i32, %c0_i32_0 : i32, i32, i32
  }
  func.func @transform_1(%arg0: i32, %arg1: i32) -> (i32, i32) {
    %c0_i32 = arith.constant 0 : i32
    %c0_i32_0 = arith.constant 0 : i32
    %c0_i32_1 = arith.constant 0 : i32
    return %c0_i32, %c0_i32_0 : i32, i32
  }
  func.func @transform_2(%arg0: i32, %arg1: i32) -> (i32, i32) {
    %c0_i32 = arith.constant 0 : i32
    %c0_i32_0 = arith.constant 0 : i32
    %c0_i32_1 = arith.constant 0 : i32
    return %c0_i32, %c0_i32_0 : i32, i32
  }
  func.func @transform_3(%arg0: i32, %arg1: i32) -> (i32, i32, i32) {
    %c0_i32 = arith.constant 0 : i32
    %c0_i32_0 = arith.constant 0 : i32
    return %arg0, %c0_i32, %arg1 : i32, i32, i32
  }
}

module attributes {stable_mosaic.version = 11 : i64} {
  func.func @kernel(%arg0: i32, %arg1: i32, %arg2: memref<1x16x400xf32, #tpu.memory_space<vmem>>, %arg3: memref<8x60xf32, #tpu.memory_space<vmem>>, %arg4: memref<8x1xf32, #tpu.memory_space<vmem>>, %arg5: memref<1x8x384xf32, #tpu.memory_space<vmem>>) attributes {dimension_semantics = [#tpu.dimension_semantics<parallel>, #tpu.dimension_semantics<arbitrary>], iteration_bounds = array<i64: 2, 1>, scalar_prefetch = 0 : i64, scratch_operands = 0 : i64, tpu.core_type = #tpu.core_type<tc>, window_params = [{transform_indices = @transform_0, window_bounds = array<i64: 1, 16, 400>}, {pipeline_mode = #tpu.pipeline_mode<synchronous>, transform_indices = @transform_1, window_bounds = array<i64: 8, 60>}, {pipeline_mode = #tpu.pipeline_mode<synchronous>, transform_indices = @transform_2, window_bounds = array<i64: 8, 1>}, {transform_indices = @transform_3, window_bounds = array<i64: 1, 8, 384>}]} {
    %c0 = arith.constant 0 : index
    %c0_0 = arith.constant 0 : index
    %c0_1 = arith.constant 0 : index
    %0 = vector.load %arg2[%c0, %c0_0, %c0_1] : memref<1x16x400xf32, #tpu.memory_space<vmem>>, vector<1x4x273xf32>
    %1 = vector.shape_cast %0 : vector<1x4x273xf32> to vector<4x273xf32>
    %c0_2 = arith.constant 0 : index
    %c0_3 = arith.constant 0 : index
    %2 = vector.load %arg3[%c0_2, %c0_3] : memref<8x60xf32, #tpu.memory_space<vmem>>, vector<8x4xf32>
    %cst = arith.constant dense<0.000000e+00> : vector<8x273xf32>
    %3 = tpu.matmul %2, %1, %cst {dimension_numbers = #tpu.dot_dimension_numbers<[1], [0], [0], [1], [0, 0, 1, 1], [], []>} : vector<8x4xf32>, vector<4x273xf32>, vector<8x273xf32> -> vector<8x273xf32>
    %c0_4 = arith.constant 0 : index
    %c4 = arith.constant 4 : index
    %c0_5 = arith.constant 0 : index
    %4 = vector.load %arg2[%c0_4, %c4, %c0_5] : memref<1x16x400xf32, #tpu.memory_space<vmem>>, vector<1x4x273xf32>
    %5 = vector.shape_cast %4 : vector<1x4x273xf32> to vector<4x273xf32>
    %c0_6 = arith.constant 0 : index
    %c4_7 = arith.constant 4 : index
    %6 = vector.load %arg3[%c0_6, %c4_7] : memref<8x60xf32, #tpu.memory_space<vmem>>, vector<8x4xf32>
    %cst_8 = arith.constant dense<0.000000e+00> : vector<8x273xf32>
    %7 = tpu.matmul %6, %5, %cst_8 {dimension_numbers = #tpu.dot_dimension_numbers<[1], [0], [0], [1], [0, 0, 1, 1], [], []>} : vector<8x4xf32>, vector<4x273xf32>, vector<8x273xf32> -> vector<8x273xf32>
    %8 = arith.addf %3, %7 : vector<8x273xf32>
    %c0_9 = arith.constant 0 : index
    %c4_10 = arith.constant 4 : index
    %c64 = arith.constant 64 : index
    %9 = vector.load %arg2[%c0_9, %c4_10, %c64] : memref<1x16x400xf32, #tpu.memory_space<vmem>>, vector<1x4x273xf32>
    %10 = vector.shape_cast %9 : vector<1x4x273xf32> to vector<4x273xf32>
    %c0_11 = arith.constant 0 : index
    %c8 = arith.constant 8 : index
    %11 = vector.load %arg3[%c0_11, %c8] : memref<8x60xf32, #tpu.memory_space<vmem>>, vector<8x4xf32>
    %cst_12 = arith.constant dense<0.000000e+00> : vector<8x273xf32>
    %12 = tpu.matmul %11, %10, %cst_12 {dimension_numbers = #tpu.dot_dimension_numbers<[1], [0], [0], [1], [0, 0, 1, 1], [], []>} : vector<8x4xf32>, vector<4x273xf32>, vector<8x273xf32> -> vector<8x273xf32>
    %13 = arith.addf %8, %12 : vector<8x273xf32>
    %c0_13 = arith.constant 0 : index
    %c8_14 = arith.constant 8 : index
    %c0_15 = arith.constant 0 : index
    %14 = vector.load %arg2[%c0_13, %c8_14, %c0_15] : memref<1x16x400xf32, #tpu.memory_space<vmem>>, vector<1x4x273xf32>
    %15 = vector.shape_cast %14 : vector<1x4x273xf32> to vector<4x273xf32>
    %c0_16 = arith.constant 0 : index
    %c12 = arith.constant 12 : index
    %16 = vector.load %arg3[%c0_16, %c12] : memref<8x60xf32, #tpu.memory_space<vmem>>, vector<8x4xf32>
    %cst_17 = arith.constant dense<0.000000e+00> : vector<8x273xf32>
    %17 = tpu.matmul %16, %15, %cst_17 {dimension_numbers = #tpu.dot_dimension_numbers<[1], [0], [0], [1], [0, 0, 1, 1], [], []>} : vector<8x4xf32>, vector<4x273xf32>, vector<8x273xf32> -> vector<8x273xf32>
    %18 = arith.addf %13, %17 : vector<8x273xf32>
    %c0_18 = arith.constant 0 : index
    %c8_19 = arith.constant 8 : index
    %c32 = arith.constant 32 : index
    %19 = vector.load %arg2[%c0_18, %c8_19, %c32] : memref<1x16x400xf32, #tpu.memory_space<vmem>>, vector<1x4x273xf32>
    %20 = vector.shape_cast %19 : vector<1x4x273xf32> to vector<4x273xf32>
    %c0_20 = arith.constant 0 : index
    %c16 = arith.constant 16 : index
    %21 = vector.load %arg3[%c0_20, %c16] : memref<8x60xf32, #tpu.memory_space<vmem>>, vector<8x4xf32>
    %cst_21 = arith.constant dense<0.000000e+00> : vector<8x273xf32>
    %22 = tpu.matmul %21, %20, %cst_21 {dimension_numbers = #tpu.dot_dimension_numbers<[1], [0], [0], [1], [0, 0, 1, 1], [], []>} : vector<8x4xf32>, vector<4x273xf32>, vector<8x273xf32> -> vector<8x273xf32>
    %23 = arith.addf %18, %22 : vector<8x273xf32>
    %c0_22 = arith.constant 0 : index
    %c8_23 = arith.constant 8 : index
    %c64_24 = arith.constant 64 : index
    %24 = vector.load %arg2[%c0_22, %c8_23, %c64_24] : memref<1x16x400xf32, #tpu.memory_space<vmem>>, vector<1x4x273xf32>
    %25 = vector.shape_cast %24 : vector<1x4x273xf32> to vector<4x273xf32>
    %c0_25 = arith.constant 0 : index
    %c20 = arith.constant 20 : index
    %26 = vector.load %arg3[%c0_25, %c20] : memref<8x60xf32, #tpu.memory_space<vmem>>, vector<8x4xf32>
    %cst_26 = arith.constant dense<0.000000e+00> : vector<8x273xf32>
    %27 = tpu.matmul %26, %25, %cst_26 {dimension_numbers = #tpu.dot_dimension_numbers<[1], [0], [0], [1], [0, 0, 1, 1], [], []>} : vector<8x4xf32>, vector<4x273xf32>, vector<8x273xf32> -> vector<8x273xf32>
    %28 = arith.addf %23, %27 : vector<8x273xf32>
    %c0_27 = arith.constant 0 : index
    %c8_28 = arith.constant 8 : index
    %c96 = arith.constant 96 : index
    %29 = vector.load %arg2[%c0_27, %c8_28, %c96] : memref<1x16x400xf32, #tpu.memory_space<vmem>>, vector<1x4x273xf32>
    %30 = vector.shape_cast %29 : vector<1x4x273xf32> to vector<4x273xf32>
    %c0_29 = arith.constant 0 : index
    %c24 = arith.constant 24 : index
    %31 = vector.load %arg3[%c0_29, %c24] : memref<8x60xf32, #tpu.memory_space<vmem>>, vector<8x4xf32>
    %cst_30 = arith.constant dense<0.000000e+00> : vector<8x273xf32>
    %32 = tpu.matmul %31, %30, %cst_30 {dimension_numbers = #tpu.dot_dimension_numbers<[1], [0], [0], [1], [0, 0, 1, 1], [], []>} : vector<8x4xf32>, vector<4x273xf32>, vector<8x273xf32> -> vector<8x273xf32>
    %33 = arith.addf %28, %32 : vector<8x273xf32>
    %c0_31 = arith.constant 0 : index
    %c12_32 = arith.constant 12 : index
    %c0_33 = arith.constant 0 : index
    %34 = vector.load %arg2[%c0_31, %c12_32, %c0_33] : memref<1x16x400xf32, #tpu.memory_space<vmem>>, vector<1x4x273xf32>
    %35 = vector.shape_cast %34 : vector<1x4x273xf32> to vector<4x273xf32>
    %c0_34 = arith.constant 0 : index
    %c28 = arith.constant 28 : index
    %36 = vector.load %arg3[%c0_34, %c28] : memref<8x60xf32, #tpu.memory_space<vmem>>, vector<8x4xf32>
    %cst_35 = arith.constant dense<0.000000e+00> : vector<8x273xf32>
    %37 = tpu.matmul %36, %35, %cst_35 {dimension_numbers = #tpu.dot_dimension_numbers<[1], [0], [0], [1], [0, 0, 1, 1], [], []>} : vector<8x4xf32>, vector<4x273xf32>, vector<8x273xf32> -> vector<8x273xf32>
    %38 = arith.addf %33, %37 : vector<8x273xf32>
    %c0_36 = arith.constant 0 : index
    %c12_37 = arith.constant 12 : index
    %c16_38 = arith.constant 16 : index
    %39 = vector.load %arg2[%c0_36, %c12_37, %c16_38] : memref<1x16x400xf32, #tpu.memory_space<vmem>>, vector<1x4x273xf32>
    %40 = vector.shape_cast %39 : vector<1x4x273xf32> to vector<4x273xf32>
    %c0_39 = arith.constant 0 : index
    %c32_40 = arith.constant 32 : index
    %41 = vector.load %arg3[%c0_39, %c32_40] : memref<8x60xf32, #tpu.memory_space<vmem>>, vector<8x4xf32>
    %cst_41 = arith.constant dense<0.000000e+00> : vector<8x273xf32>
    %42 = tpu.matmul %41, %40, %cst_41 {dimension_numbers = #tpu.dot_dimension_numbers<[1], [0], [0], [1], [0, 0, 1, 1], [], []>} : vector<8x4xf32>, vector<4x273xf32>, vector<8x273xf32> -> vector<8x273xf32>
    %43 = arith.addf %38, %42 : vector<8x273xf32>
    %c0_42 = arith.constant 0 : index
    %c12_43 = arith.constant 12 : index
    %c32_44 = arith.constant 32 : index
    %44 = vector.load %arg2[%c0_42, %c12_43, %c32_44] : memref<1x16x400xf32, #tpu.memory_space<vmem>>, vector<1x4x273xf32>
    %45 = vector.shape_cast %44 : vector<1x4x273xf32> to vector<4x273xf32>
    %c0_45 = arith.constant 0 : index
    %c36 = arith.constant 36 : index
    %46 = vector.load %arg3[%c0_45, %c36] : memref<8x60xf32, #tpu.memory_space<vmem>>, vector<8x4xf32>
    %cst_46 = arith.constant dense<0.000000e+00> : vector<8x273xf32>
    %47 = tpu.matmul %46, %45, %cst_46 {dimension_numbers = #tpu.dot_dimension_numbers<[1], [0], [0], [1], [0, 0, 1, 1], [], []>} : vector<8x4xf32>, vector<4x273xf32>, vector<8x273xf32> -> vector<8x273xf32>
    %48 = arith.addf %43, %47 : vector<8x273xf32>
    %c0_47 = arith.constant 0 : index
    %c12_48 = arith.constant 12 : index
    %c48 = arith.constant 48 : index
    %49 = vector.load %arg2[%c0_47, %c12_48, %c48] : memref<1x16x400xf32, #tpu.memory_space<vmem>>, vector<1x4x273xf32>
    %50 = vector.shape_cast %49 : vector<1x4x273xf32> to vector<4x273xf32>
    %c0_49 = arith.constant 0 : index
    %c40 = arith.constant 40 : index
    %51 = vector.load %arg3[%c0_49, %c40] : memref<8x60xf32, #tpu.memory_space<vmem>>, vector<8x4xf32>
    %cst_50 = arith.constant dense<0.000000e+00> : vector<8x273xf32>
    %52 = tpu.matmul %51, %50, %cst_50 {dimension_numbers = #tpu.dot_dimension_numbers<[1], [0], [0], [1], [0, 0, 1, 1], [], []>} : vector<8x4xf32>, vector<4x273xf32>, vector<8x273xf32> -> vector<8x273xf32>
    %53 = arith.addf %48, %52 : vector<8x273xf32>
    %c0_51 = arith.constant 0 : index
    %c12_52 = arith.constant 12 : index
    %c64_53 = arith.constant 64 : index
    %54 = vector.load %arg2[%c0_51, %c12_52, %c64_53] : memref<1x16x400xf32, #tpu.memory_space<vmem>>, vector<1x4x273xf32>
    %55 = vector.shape_cast %54 : vector<1x4x273xf32> to vector<4x273xf32>
    %c0_54 = arith.constant 0 : index
    %c44 = arith.constant 44 : index
    %56 = vector.load %arg3[%c0_54, %c44] : memref<8x60xf32, #tpu.memory_space<vmem>>, vector<8x4xf32>
    %cst_55 = arith.constant dense<0.000000e+00> : vector<8x273xf32>
    %57 = tpu.matmul %56, %55, %cst_55 {dimension_numbers = #tpu.dot_dimension_numbers<[1], [0], [0], [1], [0, 0, 1, 1], [], []>} : vector<8x4xf32>, vector<4x273xf32>, vector<8x273xf32> -> vector<8x273xf32>
    %58 = arith.addf %53, %57 : vector<8x273xf32>
    %c0_56 = arith.constant 0 : index
    %c12_57 = arith.constant 12 : index
    %c80 = arith.constant 80 : index
    %59 = vector.load %arg2[%c0_56, %c12_57, %c80] : memref<1x16x400xf32, #tpu.memory_space<vmem>>, vector<1x4x273xf32>
    %60 = vector.shape_cast %59 : vector<1x4x273xf32> to vector<4x273xf32>
    %c0_58 = arith.constant 0 : index
    %c48_59 = arith.constant 48 : index
    %61 = vector.load %arg3[%c0_58, %c48_59] : memref<8x60xf32, #tpu.memory_space<vmem>>, vector<8x4xf32>
    %cst_60 = arith.constant dense<0.000000e+00> : vector<8x273xf32>
    %62 = tpu.matmul %61, %60, %cst_60 {dimension_numbers = #tpu.dot_dimension_numbers<[1], [0], [0], [1], [0, 0, 1, 1], [], []>} : vector<8x4xf32>, vector<4x273xf32>, vector<8x273xf32> -> vector<8x273xf32>
    %63 = arith.addf %58, %62 : vector<8x273xf32>
    %c0_61 = arith.constant 0 : index
    %c12_62 = arith.constant 12 : index
    %c96_63 = arith.constant 96 : index
    %64 = vector.load %arg2[%c0_61, %c12_62, %c96_63] : memref<1x16x400xf32, #tpu.memory_space<vmem>>, vector<1x4x273xf32>
    %65 = vector.shape_cast %64 : vector<1x4x273xf32> to vector<4x273xf32>
    %c0_64 = arith.constant 0 : index
    %c52 = arith.constant 52 : index
    %66 = vector.load %arg3[%c0_64, %c52] : memref<8x60xf32, #tpu.memory_space<vmem>>, vector<8x4xf32>
    %cst_65 = arith.constant dense<0.000000e+00> : vector<8x273xf32>
    %67 = tpu.matmul %66, %65, %cst_65 {dimension_numbers = #tpu.dot_dimension_numbers<[1], [0], [0], [1], [0, 0, 1, 1], [], []>} : vector<8x4xf32>, vector<4x273xf32>, vector<8x273xf32> -> vector<8x273xf32>
    %68 = arith.addf %63, %67 : vector<8x273xf32>
    %c0_66 = arith.constant 0 : index
    %c12_67 = arith.constant 12 : index
    %c112 = arith.constant 112 : index
    %69 = vector.load %arg2[%c0_66, %c12_67, %c112] : memref<1x16x400xf32, #tpu.memory_space<vmem>>, vector<1x4x273xf32>
    %70 = vector.shape_cast %69 : vector<1x4x273xf32> to vector<4x273xf32>
    %c0_68 = arith.constant 0 : index
    %c56 = arith.constant 56 : index
    %71 = vector.load %arg3[%c0_68, %c56] : memref<8x60xf32, #tpu.memory_space<vmem>>, vector<8x4xf32>
    %cst_69 = arith.constant dense<0.000000e+00> : vector<8x273xf32>
    %72 = tpu.matmul %71, %70, %cst_69 {dimension_numbers = #tpu.dot_dimension_numbers<[1], [0], [0], [1], [0, 0, 1, 1], [], []>} : vector<8x4xf32>, vector<4x273xf32>, vector<8x273xf32> -> vector<8x273xf32>
    %73 = arith.addf %68, %72 : vector<8x273xf32>
    %c0_70 = arith.constant 0 : index
    %c0_71 = arith.constant 0 : index
    %74 = vector.load %arg4[%c0_70, %c0_71] : memref<8x1xf32, #tpu.memory_space<vmem>>, vector<8x1xf32>
    %75 = vector.broadcast %74 : vector<8x1xf32> to vector<8x273xf32>
    %76 = arith.addf %73, %75 : vector<8x273xf32>
    %c0_72 = arith.constant 0 : index
    %c0_73 = arith.constant 0 : index
    %c0_74 = arith.constant 0 : index
    %77 = vector.load %arg5[%c0_72, %c0_73, %c0_74] : memref<1x8x384xf32, #tpu.memory_space<vmem>>, vector<1x8x273xf32>
    %78 = vector.shape_cast %77 : vector<1x8x273xf32> to vector<8x273xf32>
    %79 = vector.shape_cast %76 : vector<8x273xf32> to vector<1x8x273xf32>
    tpu.vector_store %arg5[%c0_72, %c0_73, %c0_74], %79 {strides = array<i32>} : memref<1x8x384xf32, #tpu.memory_space<vmem>>, vector<1x8x273xf32>,
    return
  }
  func.func @transform_0(%arg0: i32, %arg1: i32) -> (i32, i32, i32) {
    %c0_i32 = arith.constant 0 : i32
    %c0_i32_0 = arith.constant 0 : i32
    %c0_i32_1 = arith.constant 0 : i32
    return %arg0, %c0_i32, %c0_i32_0 : i32, i32, i32
  }
  func.func @transform_1(%arg0: i32, %arg1: i32) -> (i32, i32) {
    %c0_i32 = arith.constant 0 : i32
    %c0_i32_0 = arith.constant 0 : i32
    %c0_i32_1 = arith.constant 0 : i32
    return %c0_i32, %c0_i32_0 : i32, i32
  }
  func.func @transform_2(%arg0: i32, %arg1: i32) -> (i32, i32) {
    %c0_i32 = arith.constant 0 : i32
    %c0_i32_0 = arith.constant 0 : i32
    %c0_i32_1 = arith.constant 0 : i32
    return %c0_i32, %c0_i32_0 : i32, i32
  }
  func.func @transform_3(%arg0: i32, %arg1: i32) -> (i32, i32, i32) {
    %c0_i32 = arith.constant 0 : i32
    %c0_i32_0 = arith.constant 0 : i32
    return %arg0, %c0_i32, %arg1 : i32, i32, i32
  }
}

</mosaic_0001>

<bundles_post_ra>
// kernel: tpu_custom_call.1
= control target key start
LH: loop header
LB: loop body
LE: loop exit
PB: predicated region body
PF: predicated region fallthrough
CT: control target
= control target key end

     0   :  { %8 = vsyncpa [#allocation3], 0  ;;  %s3612_s0 = inlined_call_operand.hbm [shape: f32[2,16,400], index: 0, kind: input, shape index: {}]   ;;  %s3613_s1 = inlined_call_operand.vmem [shape: f32[8,60], index: 1, kind: input, shape index: {}]   ;;  %s3614_s2 = inlined_call_operand.vmem [shape: f32[8,1], index: 2, kind: input, shape index: {}]   ;;  %s3615_s3 = inlined_call_operand.hbm [shape: f32[2,8,273], index: 3, kind: output, shape index: {}]  }
   0x1   :  { %9 = vsyncpa [#allocation4], 0 }
   0x2   :  { %11 = vsyncpa [#allocation4 + $0x1], 0  ;;  %s3200_s12 = smov 0   ;;  %s3202_s13 = smov 0  }
   0x3   :  { %s3204_s14 = smov 0   ;;  %s3206_s15 = smov 0  }
   0x4   :  { %s3208_s16 = smov 0   ;;  %s3210_s17 = smov 0  }
   0x5 LB: > { %s2735_s18 = sadd.s32 4294967295, %s3153_s17   ;;  %s2736_s19 = sadd.s32 4294967294, %s3153_s17   ;;  %s3153_s17 = sphi %s3210_s17, %s17_s17   ;;  %s3149_s16 = sphi %s3208_s16, %s3633_s16   ;;  %s3145_s15 = sphi %s3206_s15, %s3632_s15   ;;  %s3141_s14 = sphi %s3204_s14, %s3631_s14   ;;  %s3137_s13 = sphi %s3202_s13, %s3630_s13   ;;  %s3133_s12 = sphi %s3200_s12, %s3629_s12  }
   0x6   : > { %s29_s20 = sadd.s32 1, %s3149_s16  ;;  %s36_s21 = sadd.s32 1, %s3141_s14 }
   0x7   : > { %p31_p0 = scmp.ge.s32.totalorder %s29_s20, 2  ;;  %p49_p1 = scmp.ne.s32.totalorder %s3137_s13, %s3133_s12 }
   0x8   : > { %p116_p2 = scmp.ne.s32.totalorder %s3141_s14, %s3137_s13  ;;  %p50_p3 = scmp.eq.s32.totalorder %s2735_s18, 0 }
   0x9   : > { %s3635_s20 = smov (%p31_p0, %s29_s20), 0  ;;  %p117_p4 = scmp.eq.s32.totalorder %s2735_s18, 1 }
   0xa   : > { %s33_s22 = ssub.s32 %s3149_s16, %s3635_s20  ;;  %p123_p5 = scmp.eq.s32.totalorder %s2736_s19, 1 }
   0xb   : > { %p34_p6 = scmp.eq.s32.totalorder %s33_s22, 0  ;;  %p3242_p7 = por %p117_p4, %p116_p2 }
   0xc   : > { %p3246_p8 = por %p123_p5, %p49_p1  ;;  %p2737_p9 = scmp.ge.s32.totalorder %s3153_s17, 1 }
   0xd   : > { %s3620_s23 = scalar_select %p3242_p7, 1, 0 }
   0xe   : > { %s3621_s24 = scalar_select %p3246_p8, 1, 0 }
   0xf   : > { %s3252_s25 = scalar_select %p34_p6, %s3141_s14, %s36_s21  }
  0x10   : > { %p3254_p10 = por %p50_p3, %p49_p1  ;;  %p130_p11 = scmp.lt.s32.totalorder %s3153_s17, 3 }
  0x11   : > { %s2819_s27 = sshll.u32 %s3145_s15, 10  ;;  %s3155_s29 = smov [#allocation2]  }
  0x12   : > { %s3622_s26 = scalar_select %p3254_p10, 1, 0 }
  0x13   : > { %p3260_p12 = pnand %p2737_p9, %p130_p11  ;;  %s145_s30 = sshll.u32 %s3155_s29, 4  ;;  %s3271_s30 = int_to_ptr.vmem [resolvable:$true] %s145_s30 }
  0x14   : > { %s3269_s6 = scalar_lea.hbm %s3612_s0, %s2819_s27  ;;  %s3046_s11 = scalar_lea.hbm %s3612_s0, 2048 }
  0x15   : > { %s3623_s28 = scalar_select %p3260_p12, 1, 0 }
  0x16   : > { %p2959_p13 = pneg %p3260_p12  ;;  %s3041_s8 = scalar_lea.hbm %s3269_s6, 1024 }
  0x17   : > { %p3042_p1 = scmp.ne.s32.totalorder %s3269_s6, %s3041_s8  ;;  %p3047_p5 = scmp.lt.u32.totalorder %s3269_s6, %s3612_s0 }
  0x18   : > { %p3275_p0 = pnand %p2959_p13, %p3254_p10  ;;  %p3048_p6 = scmp.lt.u32.totalorder %s3046_s11, %s3041_s8 }
  0x19   : > { %p3050_p11 = scmp.lt.u32.totalorder %s3041_s8, %s3269_s6 }
  0x1a   : > { %p3043_p2 = pneg %p3275_p0  ;;  %p3049_p9 = por %p3048_p6, %p3047_p5 }
  0x1c   : > { %p3044_p3 = pnand %p3043_p2, %p3042_p1  ;;  %p3051_p13 = por %p3050_p11, %p3049_p9 }
  0x1e   : > { %p3045_p4 = pneg %p3044_p3 }
  0x20   : > { %p3052_p8 = pnand %p3051_p13, %p3045_p4 }
  0x22   : > { %3055 = shalt.err (!%p3052_p8)
}
  0x23   : > { %s3056_s21 = scalar_lea.vmem %s3271_s30, 1024  ;;  %p3064_p10 = scmp.lt.s32.totalorder %s3271_s30, %s3271_s30 }
  0x24   : > { %p3057_p1 = scmp.ne.s32.totalorder %s3271_s30, %s3056_s21  ;;  %p3065_p12 = scmp.lt.s32.totalorder %s3056_s21, %s3056_s21 }
  0x26   : > { %p3059_p3 = pnand %p3057_p1, %p3043_p2  ;;  %p3066_p5 = por %p3065_p12, %p3064_p10 }
  0x28   : > { %p3060_p7 = pneg %p3059_p3 }
  0x2a   : > { %p3067_p6 = pnand %p3066_p5, %p3060_p7 }
  0x2c   : > { %3070 = shalt.err (!%p3067_p6)
}
  0x2d   : > { %s3156_s22 = smov 512   ;;  %s3157_s27 = smov 32  }
  0x2e   : > { %2962 = dma.hbm_to_vmem [thread:$0]  (!%p3275_p0), %s3269_s6, 1024, %s3271_s30, [#allocation3], %s3156_s22, %s3156_s22, %s3157_s27  }
  0x2f   : > { %p3625_p8 = scmp.ne.s32.totalorder %s3623_s28, 0 }
  0x30   : > { %p3626_p4 = scmp.ne.s32.totalorder (!%p3625_p8), %s3622_s26, 0 }
  0x31   : > { %167 = sbr.rel (%p3625_p8) target bundleno = 515 (0x203), region = 32 }
  0x38   : > { %3124 = dma.done.wait (%p3626_p4), [#allocation3], 1024  }
  0x39   : > { %3126 = vsyncadd (%p3626_p4), [#allocation3], 4294966272  ;;  %v3158_v0 = vmov 0.0   ;;  %vm3159_vm0 = vmmov 0   ;;  %v3318_v1 = vld [vmem:[%s3613_s1] sm:$0xff]  ;;  %vm206_vm1 = vcmask 1043456  }
  0x3a   : > { %2850 = vmatprep.subr.mxu1 %v3158_v0  ;;  %277 = vmatprep.mubr.f32.mxu0 %v3158_v0  ;;  %v193_v2 = vld [vmem:[#allocation2 + $0x10] sm:$0xf0]  ;;  %v192_v3 = vld [vmem:[#allocation2 + $0x8] sm:$0xf0]  ;;  %s3160_s28 = smov 124   ;;  %s3161_s26 = smov 64  }
  0x3b   : > { %2852 = vmatprep.mubr.msk.f32.mxu1 %vm3159_vm0, %v3158_v0  ;;  %195 = vrot.lane.b32.xlu0 %v3318_v1, %s3160_s28  ;;  %v202_v4 = vrot.slane %v193_v2, 4  ;;  %v201_v5 = vrot.slane %v192_v3, 4  ;;  %v191_v6 = vld [vmem:[#allocation2] sm:$0xf0]  ;;  %v188_v8 = vld [vmem:[#allocation2 + $0x8] sm:$0xf] }
  0x3c   : > { %v200_v7 = vrot.slane %v191_v6, 4  ;;  %s3162_s4 = smov 120   ;;  %v3330_v9 = vld [vmem:[#allocation2 + $0x28] sm:$0xf]  ;;  %s3163_s5 = smov 116   ;;  %v2633_v26 = vld [vmem:[%s3614_s2] sm:$0xff] }
  0x3d   : > { %512 = vrot.lane.b32.xlu1 %v202_v4, %s3161_s26  ;;  %2741 = vmatprep.subr.msk.mxu0 %vm206_vm1, %v201_v5  ;;  %v3333_v10 = vld [vmem:[#allocation2 + $0x30] sm:$0xf]  ;;  %s3164_s6 = smov 96   ;;  %v3337_v11 = vld [vmem:[#allocation2 + $0x20] sm:$0xf]  ;;  %s3165_s7 = smov 112  }
  0x3e   : > { %2742 = vmatpush1.msk.msra.mxu0 %vm206_vm1, %v200_v7  ;;  %2851 = vmatpush3.msk.msra.mxu1 %vm206_vm1, %v202_v4  ;;  %s3166_s8 = smov 108   ;;  %s3167_s9 = smov 32   ;;  %v1318_v12 = vld [vmem:[#allocation2 + $0x28] sm:$0xf0]  ;;  %v1319_v13 = vld [vmem:[#allocation2 + $0x30] sm:$0xf0] }
  0x3f   : > { %510 = vrot.lane.b32.xlu0 %v201_v5, %s3161_s26  ;;  %2855 = vmatprep.subr.mxu1 %v3158_v0  ;;  %s3168_s10 = smov 104   ;;  %v3358_v14 = vrot.slane %v1318_v12, 4  ;;  %v1317_v15 = vld [vmem:[#allocation2 + $0x20] sm:$0xf0]  ;;  %s3169_s11 = smov 100   ;;  %v3361_v16 = vrot.slane %v1319_v13, 4 }
  0x40   : > { %2746 = vmatprep.subr.msk.mxu0 %vm206_vm1, %v188_v8  ;;  %v3364_v17 = vrot.slane %v1317_v15, 4  ;;  %s3170_s18 = smov 92   ;;  %s3171_s19 = smov 80   ;;  %v2456_v18 = vld [vmem:[#allocation2 + $0x28] sm:$0xf0]  ;;  %v3178_v27 = vmov 0  }
  0x41   : > { %508 = vrot.lane.b32.xlu1 %v200_v7, %s3161_s26  ;;  %s3172_s21 = smov 88   ;;  %s3173_s22 = smov 84   ;;  %v2457_v19 = vld [vmem:[#allocation2 + $0x30] sm:$0xf0]  ;;  %v2466_v20 = vrot.slane %v2456_v18, 4  ;;  %3040 = vset.pattern.permute.xlu0 %v3178_v27  ;;  %vm203_vm2 = vcmask 31744  }
  0x42   : > { %s3174_s27 = smov 48   ;;  %v2458_v21 = vld [vmem:[#allocation2 + $0x38] sm:$0xf0]  ;;  %s3175_s29 = smov 76   ;;  %v2467_v22 = vrot.slane %v2457_v19, 4  ;;  %vm514_vm3 = vcmask 523264  }
  0x43   : > { %506 = vrot.lane.b32.xlu0 %v3318_v1, %s3162_s4  ;;  %v2455_v23 = vld [vmem:[#allocation2 + $0x20] sm:$0xf0]  ;;  %s3176_s30 = smov 16   ;;  %v2468_v24 = vrot.slane %v2458_v21, 4  ;;  %s3177_s28 = smov 72   ;;  %vm837_vm4 = vcmask 785408  }
  0x44   : > { %v2465_v25 = vrot.slane %v2455_v23, 4  ;;  %v187_v28 = vld [vmem:[#allocation2] sm:$0xf]  ;;  %v189_v29 = vld [vmem:[#allocation2 + $0x10] sm:$0xf]  ;;  %vm1162_vm5 = vcmask 261120  }
  0x45   : > { %672 = vrot.lane.b32.xlu1 %v3318_v1, %s3163_s5  ;;  %vm1488_vm6 = vcmask 916480   ;;  %vm1813_vm7 = vcmask 654336   ;;  %vm2138_vm8 = vcmask 392192   ;;  %vm2477_vm9 = vcmask 130048   ;;  %s183_s5 = sand.u32 1, %s3137_s13   ;;  %p3627_p10 = scmp.ne.s32.totalorder %s3620_s23, 0 }
  0x46   : > { %vm2644_vm10 = vcmask 138240  }
  0x47   : > { %833 = vrot.lane.b32.xlu0 %v3330_v9, %s3164_s6 }
  0x49   : > { %835 = vrot.lane.b32.xlu1 %v3333_v10, %s3164_s6 }
  0x4b   : > { %831 = vrot.lane.b32.xlu0 %v3337_v11, %s3164_s6 }
  0x4d   : > { %829 = vrot.lane.b32.xlu1 %v3318_v1, %s3165_s7 }
  0x4f   : > { %996 = vrot.lane.b32.xlu0 %v3330_v9, %s3161_s26 }
  0x51   : > { %998 = vrot.lane.b32.xlu1 %v3333_v10, %s3161_s26 }
  0x53   : > { %994 = vrot.lane.b32.xlu0 %v3337_v11, %s3161_s26 }
  0x55   : > { %992 = vrot.lane.b32.xlu1 %v3318_v1, %s3166_s8  ;;  %s2954_s8 = smul.u32 384, %s3145_s15  ;;  %s3179_s15 = smov [#allocation5]  }
  0x57   : > { %1158 = vrot.lane.b32.xlu0 %v3330_v9, %s3167_s9 }
  0x59   : > { %1160 = vrot.lane.b32.xlu1 %v3333_v10, %s3167_s9 }
  0x5b   : > { %1156 = vrot.lane.b32.xlu0 %v3337_v11, %s3167_s9 }
  0x5d   : > { %1154 = vrot.lane.b32.xlu1 %v3318_v1, %s3168_s10 }
  0x5f   : > { %1320 = vrot.lane.b32.xlu0 %v3318_v1, %s3169_s11 }
  0x61   : > { %1484 = vrot.lane.b32.xlu1 %v3358_v14, %s3165_s7 }
  0x63   : > { %1486 = vrot.lane.b32.xlu0 %v3361_v16, %s3165_s7 }
  0x65   : > { %1482 = vrot.lane.b32.xlu1 %v3364_v17, %s3165_s7 }
  0x67   : > { %1480 = vrot.lane.b32.xlu0 %v3318_v1, %s3164_s6 }
  0x69   : > { %1647 = vrot.lane.b32.xlu1 %v3358_v14, %s3164_s6 }
  0x6b   : > { %1649 = vrot.lane.b32.xlu0 %v3361_v16, %s3164_s6 }
  0x6d   : > { %1645 = vrot.lane.b32.xlu1 %v3364_v17, %s3164_s6  ;;  %s2953_s6 = smul.u32 24, %s183_s5 }
  0x6f   : > { %1643 = vrot.lane.b32.xlu0 %v3318_v1, %s3170_s18  ;;  %s185_s7 = scalar_lea.vmem [#allocation5], %s2953_s6  ;;  %s3565_s18 = scalar_lea.hbm %s3615_s3, %s2954_s8 }
  0x71   : > { %1809 = vrot.lane.b32.xlu1 %v3358_v14, %s3171_s19 }
  0x73   : > { %1811 = vrot.lane.b32.xlu0 %v3361_v16, %s3171_s19 }
  0x75   : > { %1807 = vrot.lane.b32.xlu1 %v3364_v17, %s3171_s19 }
  0x77   : > { %1805 = vrot.lane.b32.xlu0 %v3318_v1, %s3172_s21 }
  0x79   : > { %1972 = vrot.lane.b32.xlu1 %v3358_v14, %s3161_s26 }
  0x7b   : > { %1974 = vrot.lane.b32.xlu0 %v3361_v16, %s3161_s26 }
  0x7d   : > { %1970 = vrot.lane.b32.xlu1 %v3364_v17, %s3161_s26 }
  0x7f   : > { %1968 = vrot.lane.b32.xlu0 %v3318_v1, %s3173_s22  ;;  %s3075_s22 = sshll.u32 %s3179_s15, 4  ;;  %s3076_s22 = int_to_ptr.vmem [resolvable:$false] %s3075_s22 }
  0x81   : > { %2134 = vrot.lane.b32.xlu1 %v3358_v14, %s3174_s27 }
  0x83   : > { %2136 = vrot.lane.b32.xlu0 %v3361_v16, %s3174_s27 }
  0x85   : > { %2132 = vrot.lane.b32.xlu1 %v3364_v17, %s3174_s27  ;;  %s3077_s27 = scalar_lea.vmem %s3076_s22, 768 }
  0x87   : > { %2130 = vrot.lane.b32.xlu0 %v3318_v1, %s3171_s19  ;;  %s2647_s19 = scalar_lea.sflag [#allocation4], %s183_s5 }
  0x89   : > { %2297 = vrot.lane.b32.xlu1 %v3358_v14, %s3167_s9 }
  0x8b   : > { %2299 = vrot.lane.b32.xlu0 %v3361_v16, %s3167_s9 }
  0x8d   : > { %2295 = vrot.lane.b32.xlu1 %v3364_v17, %s3167_s9  ;;  %s2663_s9 = sshll.u32 %s185_s7, 4  ;;  %s3567_s9 = int_to_ptr.vmem [resolvable:$true] %s2663_s9 }
  0x8e   : > { %s3071_s21 = scalar_lea.vmem %s3567_s9, 384  ;;  %p3078_p2 = scmp.lt.s32.totalorder %s3567_s9, %s3076_s22 }
  0x8f   : > { %2293 = vrot.lane.b32.xlu0 %v3318_v1, %s3175_s29  ;;  %p3072_p7 = scmp.ne.s32.totalorder %s3567_s9, %s3071_s21  ;;  %p3079_p9 = scmp.lt.s32.totalorder %s3077_s27, %s3071_s21 }
  0x91   : > { %2471 = vrot.lane.b32.xlu1 %v2466_v20, %s3176_s30  ;;  %p3073_p12 = pnand %p3072_p7, %p3627_p10  ;;  %p3080_p11 = por %p3079_p9, %p3078_p2 }
  0x93   : > { %2473 = vrot.lane.b32.xlu0 %v2467_v22, %s3176_s30  ;;  %p3074_p0 = pneg %p3073_p12 }
  0x95   : > { %2475 = vrot.lane.b32.xlu1 %v2468_v24, %s3176_s30  ;;  %p3081_p13 = pnand %p3080_p11, %p3074_p0 }
  0x97   : > { %2469 = vrot.lane.b32.xlu0 %v2465_v25, %s3176_s30 }
  0x99   : > { %2459 = vrot.lane.b32.xlu1 %v3318_v1, %s3177_s28 }
  0x9b   : > { %2636 = vperm.xlu0 %3040, %v2633_v26  }
  0xad   : > { %v196_v30 = vpop.permute.xlu0 %195 }
  0xae   : > { %2743 = vmatmul.mubr.msk.f32.vlgmr.msra.gmra.mrb[0].mxu0 %vm203_vm2, %v196_v30  ;;  %2853 = vmatmul.mubr.msk.f32.vlgmr.msra.gmra.mrb[0].mxu1 %vm203_vm2, %v196_v30 }
  0xaf   : > { %2747 = vmatpush1.msk.msra.mxu0 %vm206_vm1, %v187_v28  ;;  %v513_v31 = vpop.permute.xlu1 %512  ;;  %2856 = vmatpush3.msk.msra.mxu1 %vm206_vm1, %v189_v29 }
  0xb0   : > { %2857 = vmatprep.mubr.msk.f32.mxu1 %vm3159_vm0, %v3158_v0  ;;  %2860 = vmatprep.subr.mxu1 %v3158_v0 }
  0xb1   : > { %v511_v32 = vpop.permute.xlu0 %510  ;;  %429 = vmatprep.mubr.f32.mxu0 %v3158_v0 }
  0xb2   : > { %v516_v33 = vsel %vm514_vm3, %v511_v32, %v513_v31  ;;  %2858 = vmatmul.mubr.msk.f32.vlgmr.msra.gmra.mrb[2].mxu1 %vm203_vm2, %v3318_v1 }
  0xb3   : > { %2861 = vmatpush3.msk.msra.mxu1 %vm206_vm1, %v513_v31  ;;  %v509_v34 = vpop.permute.xlu1 %508  ;;  %2751 = vmatprep.subr.msk.mxu0 %vm206_vm1, %v516_v33 }
  0xb4   : > { %v515_v35 = vsel %vm514_vm3, %v509_v34, %v511_v32  ;;  %2862 = vmatprep.mubr.msk.f32.mxu1 %vm3159_vm0, %v3158_v0  ;;  %2865 = vmatprep.subr.mxu1 %v3158_v0 }
  0xb5   : > { %v507_v36 = vpop.permute.xlu0 %506 }
  0xb6   : > { %2748 = vmatmul.mubr.msk.f32.vlgmr.msra.gmra.mrb[0].mxu0 %vm203_vm2, %v3318_v1  ;;  %2863 = vmatmul.mubr.msk.f32.vlgmr.msra.gmra.mrb[4].mxu1 %vm203_vm2, %v507_v36 }
  0xb7   : > { %2752 = vmatpush1.msk.msra.mxu0 %vm206_vm1, %v515_v35  ;;  %v673_v37 = vpop.permute.xlu1 %672  ;;  %2866 = vmatpush3.msk.msra.mxu1 %vm206_vm1, %v3333_v10 }
  0xb8   : > { %2867 = vmatprep.mubr.msk.f32.mxu1 %vm3159_vm0, %v3158_v0  ;;  %589 = vmatprep.mubr.f32.mxu0 %v3158_v0 }
  0xb9   : > { %v834_v38 = vpop.permute.xlu0 %833  ;;  %2756 = vmatprep.subr.msk.mxu0 %vm206_vm1, %v3330_v9  ;;  %2870 = vmatprep.subr.mxu1 %v3158_v0 }
  0xba   : > { %2868 = vmatmul.mubr.msk.f32.vlgmr.msra.gmra.mrb[6].mxu1 %vm203_vm2, %v673_v37 }
  0xbb   : > { %v836_v39 = vpop.permute.xlu1 %835  ;;  %2872 = vmatprep.mubr.msk.f32.mxu1 %vm3159_vm0, %v3158_v0 }
  0xbc   : > { %2871 = vmatpush3.msk.msra.mxu1 %vm206_vm1, %v836_v39  ;;  %v839_v40 = vsel %vm837_vm4, %v834_v38, %v836_v39 }
  0xbd   : > { %v832_v41 = vpop.permute.xlu0 %831  ;;  %2875 = vmatprep.subr.mxu1 %v3158_v0 }
  0xbe   : > { %2753 = vmatmul.mubr.msk.f32.vlgmr.msra.gmra.mrb[0].mxu0 %vm203_vm2, %v507_v36  ;;  %v838_v45 = vsel %vm837_vm4, %v832_v41, %v834_v38 }
  0xbf   : > { %2757 = vmatpush1.msk.msra.mxu0 %vm206_vm1, %v3337_v11  ;;  %v830_v42 = vpop.permute.xlu1 %829  ;;  %749 = vmatprep.mubr.f32.mxu0 %v3158_v0 }
  0xc0   : > { %2873 = vmatmul.mubr.msk.f32.vlgmr.msra.gmra.mrb[8].mxu1 %vm203_vm2, %v830_v42  ;;  %2761 = vmatprep.subr.msk.mxu0 %vm206_vm1, %v839_v40 }
  0xc1   : > { %v997_v43 = vpop.permute.xlu0 %996  ;;  %2877 = vmatprep.mubr.msk.f32.mxu1 %vm3159_vm0, %v3158_v0 }
  0xc3   : > { %v999_v44 = vpop.permute.xlu1 %998 }
  0xc4   : > { %2876 = vmatpush3.msk.msra.mxu1 %vm206_vm1, %v999_v44  ;;  %v1001_v46 = vsel %vm514_vm3, %v997_v43, %v999_v44 }
  0xc5   : > { %v995_v47 = vpop.permute.xlu0 %994  ;;  %2880 = vmatprep.subr.mxu1 %v3158_v0 }
  0xc6   : > { %2758 = vmatmul.mubr.msk.f32.vlgmr.msra.gmra.mrb[0].mxu0 %vm203_vm2, %v673_v37  ;;  %v1000_v51 = vsel %vm514_vm3, %v995_v47, %v997_v43 }
  0xc7   : > { %2762 = vmatpush1.msk.msra.mxu0 %vm206_vm1, %v838_v45  ;;  %v993_v48 = vpop.permute.xlu1 %992  ;;  %912 = vmatprep.mubr.f32.mxu0 %v3158_v0 }
  0xc8   : > { %2878 = vmatmul.mubr.msk.f32.vlgmr.msra.gmra.mrb[10].mxu1 %vm203_vm2, %v993_v48  ;;  %2766 = vmatprep.subr.msk.mxu0 %vm206_vm1, %v1001_v46 }
  0xc9   : > { %v1159_v49 = vpop.permute.xlu0 %1158  ;;  %2882 = vmatprep.mubr.msk.f32.mxu1 %vm3159_vm0, %v3158_v0 }
  0xcb   : > { %v1161_v50 = vpop.permute.xlu1 %1160 }
  0xcc   : > { %2881 = vmatpush3.msk.msra.mxu1 %vm206_vm1, %v1161_v50  ;;  %v1164_v52 = vsel %vm1162_vm5, %v1159_v49, %v1161_v50 }
  0xcd   : > { %v1157_v53 = vpop.permute.xlu0 %1156  ;;  %2885 = vmatprep.subr.mxu1 %v3158_v0 }
  0xce   : > { %2763 = vmatmul.mubr.msk.f32.vlgmr.msra.gmra.mrb[0].mxu0 %vm203_vm2, %v830_v42  ;;  %v1163_v57 = vsel %vm1162_vm5, %v1157_v53, %v1159_v49 }
  0xcf   : > { %2767 = vmatpush1.msk.msra.mxu0 %vm206_vm1, %v1000_v51  ;;  %v1155_v54 = vpop.permute.xlu1 %1154  ;;  %1074 = vmatprep.mubr.f32.mxu0 %v3158_v0 }
  0xd0   : > { %2883 = vmatmul.mubr.msk.f32.vlgmr.msra.gmra.mrb[12].mxu1 %vm203_vm2, %v1155_v54  ;;  %2771 = vmatprep.subr.msk.mxu0 %vm206_vm1, %v1164_v52 }
  0xd1   : > { %v1321_v55 = vpop.permute.xlu0 %1320  ;;  %2886 = vmatpush3.msk.msra.mxu1 %vm206_vm1, %v3361_v16  ;;  %2887 = vmatprep.mubr.msk.f32.mxu1 %vm3159_vm0, %v3158_v0 }
  0xd2   : > { %2890 = vmatprep.subr.mxu1 %v3158_v0 }
  0xd3   : > { %v1485_v56 = vpop.permute.xlu1 %1484 }
  0xd4   : > { %2888 = vmatmul.mubr.msk.f32.vlgmr.msra.gmra.mrb[14].mxu1 %vm203_vm2, %v1321_v55 }
  0xd5   : > { %v1487_v58 = vpop.permute.xlu0 %1486  ;;  %2892 = vmatprep.mubr.msk.f32.mxu1 %vm3159_vm0, %v3158_v0 }
  0xd6   : > { %2768 = vmatmul.mubr.msk.f32.vlgmr.msra.gmra.mrb[0].mxu0 %vm203_vm2, %v993_v48  ;;  %2891 = vmatpush3.msk.msra.mxu1 %vm206_vm1, %v1487_v58  ;;  %v1490_v62 = vsel %vm1488_vm6, %v1485_v56, %v1487_v58 }
  0xd7   : > { %2772 = vmatpush1.msk.msra.mxu0 %vm206_vm1, %v1163_v57  ;;  %v1483_v59 = vpop.permute.xlu1 %1482  ;;  %1237 = vmatprep.mubr.f32.mxu0 %v3158_v0 }
  0xd8   : > { %2776 = vmatprep.subr.msk.mxu0 %vm206_vm1, %v3358_v14  ;;  %2895 = vmatprep.subr.mxu1 %v3158_v0  ;;  %v1489_v4 = vsel %vm1488_vm6, %v1483_v59, %v1485_v56 }
  0xd9   : > { %v1481_v60 = vpop.permute.xlu0 %1480 }
  0xda   : > { %2893 = vmatmul.mubr.msk.f32.vlgmr.msra.gmra.mrb[16].mxu1 %vm203_vm2, %v1481_v60 }
  0xdb   : > { %v1648_v61 = vpop.permute.xlu1 %1647  ;;  %2897 = vmatprep.mubr.msk.f32.mxu1 %vm3159_vm0, %v3158_v0 }
  0xdd   : > { %v1650_v63 = vpop.permute.xlu0 %1649 }
  0xde   : > { %2773 = vmatmul.mubr.msk.f32.vlgmr.msra.gmra.mrb[0].mxu0 %vm203_vm2, %v1155_v54  ;;  %2896 = vmatpush3.msk.msra.mxu1 %vm206_vm1, %v1650_v63  ;;  %v1652_v5 = vsel %vm837_vm4, %v1648_v61, %v1650_v63 }
  0xdf   : > { %2777 = vmatpush1.msk.msra.mxu0 %vm206_vm1, %v3364_v17  ;;  %v1646_v1 = vpop.permute.xlu1 %1645  ;;  %1400 = vmatprep.mubr.f32.mxu0 %v3158_v0 }
  0xe0   : > { %2781 = vmatprep.subr.msk.mxu0 %vm206_vm1, %v1490_v62  ;;  %2900 = vmatprep.subr.mxu1 %v3158_v0  ;;  %v1651_v10 = vsel %vm837_vm4, %v1646_v1, %v1648_v61 }
  0xe1   : > { %v1644_v2 = vpop.permute.xlu0 %1643 }
  0xe2   : > { %2898 = vmatmul.mubr.msk.f32.vlgmr.msra.gmra.mrb[18].mxu1 %vm203_vm2, %v1644_v2 }
  0xe3   : > { %v1810_v3 = vpop.permute.xlu1 %1809  ;;  %2902 = vmatprep.mubr.msk.f32.mxu1 %vm3159_vm0, %v3158_v0 }
  0xe5   : > { %v1812_v6 = vpop.permute.xlu0 %1811 }
  0xe6   : > { %2778 = vmatmul.mubr.msk.f32.vlgmr.msra.gmra.mrb[0].mxu0 %vm203_vm2, %v1321_v55  ;;  %2901 = vmatpush3.msk.msra.mxu1 %vm206_vm1, %v1812_v6  ;;  %v1815_v11 = vsel %vm1813_vm7, %v1810_v3, %v1812_v6 }
  0xe7   : > { %2782 = vmatpush1.msk.msra.mxu0 %vm206_vm1, %v1489_v4  ;;  %v1808_v7 = vpop.permute.xlu1 %1807  ;;  %1563 = vmatprep.mubr.f32.mxu0 %v3158_v0 }
  0xe8   : > { %2786 = vmatprep.subr.msk.mxu0 %vm206_vm1, %v1652_v5  ;;  %2905 = vmatprep.subr.mxu1 %v3158_v0  ;;  %v1814_v16 = vsel %vm1813_vm7, %v1808_v7, %v1810_v3 }
  0xe9   : > { %v1806_v8 = vpop.permute.xlu0 %1805 }
  0xea   : > { %2903 = vmatmul.mubr.msk.f32.vlgmr.msra.gmra.mrb[20].mxu1 %vm203_vm2, %v1806_v8 }
  0xeb   : > { %v1973_v9 = vpop.permute.xlu1 %1972  ;;  %2907 = vmatprep.mubr.msk.f32.mxu1 %vm3159_vm0, %v3158_v0 }
  0xed   : > { %v1975_v12 = vpop.permute.xlu0 %1974 }
  0xee   : > { %2783 = vmatmul.mubr.msk.f32.vlgmr.msra.gmra.mrb[0].mxu0 %vm203_vm2, %v1481_v60  ;;  %2906 = vmatpush3.msk.msra.mxu1 %vm206_vm1, %v1975_v12  ;;  %v1977_v17 = vsel %vm514_vm3, %v1973_v9, %v1975_v12 }
  0xef   : > { %2787 = vmatpush1.msk.msra.mxu0 %vm206_vm1, %v1651_v10  ;;  %v1971_v13 = vpop.permute.xlu1 %1970  ;;  %1725 = vmatprep.mubr.f32.mxu0 %v3158_v0 }
  0xf0   : > { %2791 = vmatprep.subr.msk.mxu0 %vm206_vm1, %v1815_v11  ;;  %2910 = vmatprep.subr.mxu1 %v3158_v0  ;;  %v1976_v22 = vsel %vm514_vm3, %v1971_v13, %v1973_v9 }
  0xf1   : > { %v1969_v14 = vpop.permute.xlu0 %1968 }
  0xf2   : > { %2908 = vmatmul.mubr.msk.f32.vlgmr.msra.gmra.mrb[22].mxu1 %vm203_vm2, %v1969_v14 }
  0xf3   : > { %v2135_v15 = vpop.permute.xlu1 %2134  ;;  %2912 = vmatprep.mubr.msk.f32.mxu1 %vm3159_vm0, %v3158_v0 }
  0xf5   : > { %v2137_v18 = vpop.permute.xlu0 %2136 }
  0xf6   : > { %2788 = vmatmul.mubr.msk.f32.vlgmr.msra.gmra.mrb[0].mxu0 %vm203_vm2, %v1644_v2  ;;  %2911 = vmatpush3.msk.msra.mxu1 %vm206_vm1, %v2137_v18  ;;  %v2140_v23 = vsel %vm2138_vm8, %v2135_v15, %v2137_v18 }
  0xf7   : > { %2792 = vmatpush1.msk.msra.mxu0 %vm206_vm1, %v1814_v16  ;;  %v2133_v19 = vpop.permute.xlu1 %2132  ;;  %1888 = vmatprep.mubr.f32.mxu0 %v3158_v0 }
  0xf8   : > { %2796 = vmatprep.subr.msk.mxu0 %vm206_vm1, %v1977_v17  ;;  %2915 = vmatprep.subr.mxu1 %v3158_v0  ;;  %v2139_v28 = vsel %vm2138_vm8, %v2133_v19, %v2135_v15 }
  0xf9   : > { %v2131_v20 = vpop.permute.xlu0 %2130 }
  0xfa   : > { %2913 = vmatmul.mubr.msk.f32.vlgmr.msra.gmra.mrb[24].mxu1 %vm203_vm2, %v2131_v20 }
  0xfb   : > { %v2298_v21 = vpop.permute.xlu1 %2297  ;;  %2917 = vmatprep.mubr.msk.f32.mxu1 %vm3159_vm0, %v3158_v0 }
  0xfd   : > { %v2300_v24 = vpop.permute.xlu0 %2299 }
  0xfe   : > { %2793 = vmatmul.mubr.msk.f32.vlgmr.msra.gmra.mrb[0].mxu0 %vm203_vm2, %v1806_v8  ;;  %2916 = vmatpush3.msk.msra.mxu1 %vm206_vm1, %v2300_v24  ;;  %v2302_v29 = vsel %vm1162_vm5, %v2298_v21, %v2300_v24 }
  0xff   : > { %2797 = vmatpush1.msk.msra.mxu0 %vm206_vm1, %v1976_v22  ;;  %v2296_v25 = vpop.permute.xlu1 %2295  ;;  %2050 = vmatprep.mubr.f32.mxu0 %v3158_v0 }
 0x100   : > { %2801 = vmatprep.subr.msk.mxu0 %vm206_vm1, %v2140_v23  ;;  %2920 = vmatprep.subr.mxu1 %v3158_v0  ;;  %v2301_v34 = vsel %vm1162_vm5, %v2296_v25, %v2298_v21 }
 0x101   : > { %v2294_v26 = vpop.permute.xlu0 %2293 }
 0x102   : > { %2918 = vmatmul.mubr.msk.f32.vlgmr.msra.gmra.mrb[26].mxu1 %vm203_vm2, %v2294_v26 }
 0x103   : > { %v2472_v27 = vpop.permute.xlu1 %2471  ;;  %2922 = vmatprep.mubr.msk.f32.mxu1 %vm3159_vm0, %v3158_v0 }
 0x105   : > { %v2474_v30 = vpop.permute.xlu0 %2473 }
 0x106   : > { %2798 = vmatmul.mubr.msk.f32.vlgmr.msra.gmra.mrb[0].mxu0 %vm203_vm2, %v1969_v14  ;;  %v2479_v35 = vsel %vm2477_vm9, %v2472_v27, %v2474_v30 }
 0x107   : > { %2802 = vmatpush1.msk.msra.mxu0 %vm206_vm1, %v2139_v28  ;;  %v2476_v31 = vpop.permute.xlu1 %2475  ;;  %2213 = vmatprep.mubr.f32.mxu0 %v3158_v0 }
 0x108   : > { %v2480_v32 = vsel %vm2477_vm9, %v2474_v30, %v2476_v31  ;;  %2806 = vmatprep.subr.msk.mxu0 %vm206_vm1, %v2302_v29 }
 0x109   : > { %2921 = vmatpush3.msk.msra.mxu1 %vm206_vm1, %v2480_v32  ;;  %v2470_v36 = vpop.permute.xlu0 %2469 }
 0x10a   : > { %v2478_v37 = vsel %vm2477_vm9, %v2470_v36, %v2472_v27 }
 0x10b   : > { %v2460_v33 = vpop.permute.xlu1 %2459 }
 0x10c   : > { %2923 = vmatmul.mubr.msk.f32.vlgmr.msra.gmra.mrb[28].mxu1 %vm203_vm2, %v2460_v33 }
 0x10e   : > { %2803 = vmatmul.mubr.msk.f32.vlgmr.msra.gmra.mrb[0].mxu0 %vm203_vm2, %v2131_v20 }
 0x10f   : > { %2807 = vmatpush1.msk.msra.mxu0 %vm206_vm1, %v2301_v34  ;;  %2375 = vmatprep.mubr.f32.mxu0 %v3158_v0 }
 0x110   : > { %2811 = vmatprep.subr.msk.mxu0 %vm206_vm1, %v2479_v35 }
 0x116   : > { %2808 = vmatmul.mubr.msk.f32.vlgmr.msra.gmra.mrb[0].mxu0 %vm203_vm2, %v2294_v26 }
 0x117   : > { %2812 = vmatpush1.msk.msra.mxu0 %vm206_vm1, %v2478_v37  ;;  %2553 = vmatprep.mubr.f32.mxu0 %v3158_v0 }
 0x11a   : > { %v2637_v16 = vpop.permute.xlu0 %2636 }
 0x11e   : > { %2813 = vmatmul.mubr.msk.f32.vlgmr.msra.gmra.mrb[0].mxu0 %vm203_vm2, %v2460_v33 }
 0x181   : > { %v350_v38 = vpop.f32.mrb[0].mxu1 }
 0x182   : > { %v2854_v39 = vpop.f32.mrb[1].mxu1 }
 0x185   : > { %v502_v40 = vpop.f32.mrb[2].mxu1 }
 0x186   : > { %v503_v41 = vadd.f32 %v502_v40, %v350_v38  ;;  %v2859_v42 = vpop.f32.mrb[3].mxu1 }
 0x189   : > { %v662_v43 = vpop.f32.mrb[4].mxu1 }
 0x18a   : > { %v668_v44 = vadd.f32 %v662_v43, %v503_v41  ;;  %v2864_v45 = vpop.f32.mrb[5].mxu1 }
 0x18d   : > { %v822_v46 = vpop.f32.mrb[6].mxu1 }
 0x18e   : > { %v828_v47 = vadd.f32 %v822_v46, %v668_v44  ;;  %v2869_v48 = vpop.f32.mrb[7].mxu1 }
 0x193   : > { %v985_v49 = vpop.f32.mrb[8].mxu1 }
 0x194   : > { %v991_v50 = vadd.f32 %v985_v49, %v828_v47  ;;  %v2874_v51 = vpop.f32.mrb[9].mxu1 }
 0x19b   : > { %v1147_v52 = vpop.f32.mrb[10].mxu1 }
 0x19c   : > { %v1153_v53 = vadd.f32 %v1147_v52, %v991_v50  ;;  %v2879_v54 = vpop.f32.mrb[11].mxu1 }
 0x1a3   : > { %v1310_v0 = vpop.f32.mrb[12].mxu1 }
 0x1a4   : > { %v1316_v55 = vadd.f32 %v1310_v0, %v1153_v53  ;;  %v2884_v56 = vpop.f32.mrb[13].mxu1 }
 0x1a7   : > { %v1473_v57 = vpop.f32.mrb[14].mxu1 }
 0x1a8   : > { %v1479_v58 = vadd.f32 %v1473_v57, %v1316_v55  ;;  %v2889_v59 = vpop.f32.mrb[15].mxu1 }
 0x1ad   : > { %v1636_v60 = vpop.f32.mrb[16].mxu1 }
 0x1ae   : > { %v1642_v61 = vadd.f32 %v1636_v60, %v1479_v58  ;;  %v2894_v62 = vpop.f32.mrb[17].mxu1 }
 0x1b5   : > { %v1798_v63 = vpop.f32.mrb[18].mxu1 }
 0x1b6   : > { %v1804_v1 = vadd.f32 %v1798_v63, %v1642_v61  ;;  %v2899_v2 = vpop.f32.mrb[19].mxu1 }
 0x1bd   : > { %v1961_v3 = vpop.f32.mrb[20].mxu1 }
 0x1be   : > { %v1967_v4 = vadd.f32 %v1961_v3, %v1804_v1  ;;  %v2904_v5 = vpop.f32.mrb[21].mxu1 }
 0x1c5   : > { %v2123_v6 = vpop.f32.mrb[22].mxu1 }
 0x1c6   : > { %v2129_v7 = vadd.f32 %v2123_v6, %v1967_v4  ;;  %v2909_v8 = vpop.f32.mrb[23].mxu1 }
 0x1cd   : > { %v2286_v9 = vpop.f32.mrb[24].mxu1 }
 0x1ce   : > { %v2292_v10 = vadd.f32 %v2286_v9, %v2129_v7  ;;  %v2914_v11 = vpop.f32.mrb[25].mxu1 }
 0x1d5   : > { %v2448_v12 = vpop.f32.mrb[26].mxu1 }
 0x1d6   : > { %v2454_v13 = vadd.f32 %v2448_v12, %v2292_v10  ;;  %v2919_v14 = vpop.f32.mrb[27].mxu1 }
 0x1df   : > { %v2626_v15 = vpop.f32.mrb[28].mxu1 }
 0x1e0   : > { %v2632_v17 = vadd.f32 %v2626_v15, %v2454_v13  ;;  %v2924_v18 = vpop.f32.mrb[29].mxu1 }
 0x1e2   : > { %v2641_v19 = vadd.f32 %v2637_v16, %v2632_v17 }
 0x1e4   : > { %2645 = vst.msk [vmem:[%s185_s7 + $0x10] sm:$0xff] %vm2644_vm10, %v2641_v19 }
 0x1f1   : > { %v2555_v20 = vpop.f32.mrb[0].mxu0 }
 0x1f2   : > { %v2639_v21 = vadd.f32 %v2637_v16, %v2555_v20  ;;  %v2557_v22 = vpop.f32.mrb[1].mxu0 }
 0x1f3   : > { %v2640_v23 = vadd.f32 %v2637_v16, %v2557_v22 }
 0x1f4   : > { %2642 = vst [vmem:[%s185_s7] sm:$0xff] %v2639_v21 }
 0x1f5   : > { %2643 = vst [vmem:[%s185_s7 + $0x8] sm:$0xff] %v2640_v23 }
 0x1f6   : > { %3084 = shalt.err (!%p3081_p13)
}
 0x1f7   : > { %s3085_s29 = scalar_lea.hbm %s3565_s18, 384  ;;  %s3089_s26 = scalar_lea.hbm %s3615_s3, 768 }
 0x1f8   : > { %p3086_p1 = scmp.ne.s32.totalorder %s3565_s18, %s3085_s29  ;;  %p3090_p6 = scmp.lt.u32.totalorder %s3565_s18, %s3615_s3 }
 0x1f9   : > { %p3091_p8 = scmp.lt.u32.totalorder %s3089_s26, %s3085_s29  ;;  %p3093_p7 = scmp.lt.u32.totalorder %s3085_s29, %s3565_s18 }
 0x1fa   : > { %p3087_p3 = pnand %p3086_p1, %p3627_p10 }
 0x1fb   : > { %p3092_p4 = por %p3091_p8, %p3090_p6 }
 0x1fc   : > { %p3088_p5 = pneg %p3087_p3 }
 0x1fd   : > { %p3094_p12 = por %p3093_p7, %p3092_p4 }
 0x1ff   : > { %p3095_p0 = pnand %p3094_p12, %p3088_p5 }
 0x201   : > { %3098 = shalt.err (!%p3095_p0)
}
 0x202   : > { %2957 = dma.vmem_to_hbm [thread:$0]  (%p3627_p10), %s3567_s9, 384, %s3565_s18, %s2647_s19  }
 0x203 PF: > { %p2967_p2 = scmp.ge.s32.totalorder %s3153_s17, 2  ;;  %s2675_s6 = sand.u32 1, %s3133_s12  }
 0x204   : > { %p3628_p9 = scmp.ne.s32.totalorder %s3621_s24, 0  ;;  %s2676_s7 = scalar_lea.sflag [#allocation4], %s2675_s6 }
 0x206   : > { %p2964_p11 = pnand %p2967_p2, %p3628_p9 }
 0x208   : > { %3128 = dma.done.wait (!%p2964_p11), %s2676_s7, 384  }
 0x209   : > { %3130 = vsyncadd (!%p2964_p11), %s2676_s7, 4294966912  ;;  %s17_s17 = sadd.s32 1, %s3153_s17   ;;  %s3629_s12 = smov %s3137_s13 }
 0x20a   : > { %p14_p13 = scmp.ge.s32.totalorder %s17_s17, 4   ;;  %s3630_s13 = smov %s3141_s14 }
 0x20b   : > { %s3631_s14 = smov %s3252_s25  ;;  %s3632_s15 = smov %s3149_s16 }
 0x20c   : > { %s3633_s16 = smov %s3635_s20  ;;  %16 = sbr.rel (!%p14_p13) target bundleno = 5 (0x5), region = 70 }
 0x213   :  { %2681 = vsyncpa [#allocation3], 1 }
 0x214   :  { %2683 = vsyncpa [#allocation3 + $0x1], 1 }
 0x215   :  { %2684 = vsyncpa [#allocation4], 1 }
 0x216   :  { %2686 = vsyncpa [#allocation4 + $0x1], 1 }

// kernel: tpu_custom_call.1
= control target key start
LH: loop header
LB: loop body
LE: loop exit
PB: predicated region body
PF: predicated region fallthrough
CT: control target
= control target key end

     0   :  { %8 = vsyncpa [#allocation3], 0  ;;  %s3670_s0 = inlined_call_operand.hbm [shape: f32[2,16,400], index: 0, kind: input, shape index: {}]   ;;  %s3671_s1 = inlined_call_operand.vmem [shape: f32[8,60], index: 1, kind: input, shape index: {}]   ;;  %s3672_s2 = inlined_call_operand.vmem [shape: f32[8,1], index: 2, kind: input, shape index: {}]   ;;  %s3673_s3 = inlined_call_operand.hbm [shape: f32[2,8,273], index: 3, kind: output, shape index: {}]  }
   0x1   :  { %10 = vsyncpa [#allocation3 + $0x1], 0 }
   0x2   :  { %11 = vsyncpa [#allocation4], 0 }
   0x3   :  { %13 = vsyncpa [#allocation4 + $0x1], 0  ;;  %s3229_s12 = smov 0   ;;  %s3231_s13 = smov 0  }
   0x4   :  { %s3233_s14 = smov 0   ;;  %s3235_s15 = smov 0  }
   0x5   :  { %s3237_s16 = smov 0   ;;  %s3239_s17 = smov 0  }
   0x6 LB: > { %s2761_s18 = sadd.s32 4294967295, %s3182_s17   ;;  %s2762_s19 = sadd.s32 4294967294, %s3182_s17   ;;  %s3182_s17 = sphi %s3239_s17, %s19_s17   ;;  %s3178_s16 = sphi %s3237_s16, %s3688_s16   ;;  %s3174_s15 = sphi %s3235_s15, %s3687_s15   ;;  %s3170_s14 = sphi %s3233_s14, %s3686_s14   ;;  %s3166_s13 = sphi %s3231_s13, %s3685_s13   ;;  %s3162_s12 = sphi %s3229_s12, %s3684_s12  }
   0x7   : > { %s31_s20 = sadd.s32 1, %s3178_s16  ;;  %s38_s21 = sadd.s32 1, %s3170_s14 }
   0x8   : > { %p33_p0 = scmp.ge.s32.totalorder %s31_s20, 2  ;;  %p45_p1 = scmp.ne.s32.totalorder %s3170_s14, %s3166_s13 }
   0x9   : > { %p46_p2 = scmp.eq.s32.totalorder %s3182_s17, 0  ;;  %p51_p3 = scmp.ne.s32.totalorder %s3166_s13, %s3162_s12 }
   0xa   : > { %s3690_s20 = smov (%p33_p0, %s31_s20), 0  ;;  %p52_p5 = scmp.eq.s32.totalorder %s2761_s18, 0 }
   0xb   : > { %p3270_p4 = por %p46_p2, %p45_p1  ;;  %s35_s23 = ssub.s32 %s3178_s16, %s3690_s20 }
   0xc   : > { %p119_p6 = scmp.eq.s32.totalorder %s2761_s18, 1  ;;  %p36_p7 = scmp.eq.s32.totalorder %s35_s23, 0 }
   0xd   : > { %p3276_p8 = por %p52_p5, %p51_p3  ;;  %p125_p10 = scmp.eq.s32.totalorder %s2762_s19, 1 }
   0xe   : > { %p3280_p9 = por %p119_p6, %p45_p1  ;;  %p2996_p13 = scmp.lt.s32.totalorder %s3182_s17, 2 }
   0xf   : > { %s3285_s26 = scalar_select %p36_p7, %s3170_s14, %s38_s21  }
  0x10   : > { %s3677_s25 = scalar_select %p3280_p9, 1, 0 }
  0x11   : > { %p3287_p11 = por %p125_p10, %p51_p3  ;;  %s151_s28 = sand.u32 1, %s3170_s14  }
  0x12   : > { %s2765_s29 = sshll.u32 %s151_s28, 6  ;;  %s2848_s30 = sshll.u32 %s3178_s16, 10 }
  0x13   : > { %s3678_s27 = scalar_select %p3287_p11, 1, 0 }
  0x14   : > { %s3298_s6 = scalar_lea.hbm %s3670_s0, %s2848_s30  ;;  %s155_s7 = scalar_lea.vmem [#allocation2], %s2765_s29 }
  0x15   : > { %s162_s8 = sshll.u32 %s155_s7, 4  ;;  %p3304_p0 = pnand %p2996_p13, %p3270_p4  ;;  %s3300_s8 = int_to_ptr.vmem [resolvable:$true] %s162_s8 }
  0x16   : > { %s3309_s10 = scalar_lea.sflag [#allocation3], %s151_s28  ;;  %s3070_s11 = scalar_lea.hbm %s3298_s6, 1024 }
  0x17   : > { %p3071_p2 = scmp.ne.s32.totalorder %s3298_s6, %s3070_s11  ;;  %p3072_p3 = pneg %p3304_p0 }
  0x18   : > { %s3075_s21 = scalar_lea.hbm %s3670_s0, 2048  ;;  %p3076_p4 = scmp.lt.u32.totalorder %s3298_s6, %s3670_s0 }
  0x19   : > { %p3073_p5 = pnand %p3072_p3, %p3071_p2  ;;  %p3077_p7 = scmp.lt.u32.totalorder %s3075_s21, %s3070_s11 }
  0x1a   : > { %p3079_p13 = scmp.lt.u32.totalorder %s3070_s11, %s3298_s6 }
  0x1b   : > { %p3074_p6 = pneg %p3073_p5  ;;  %p3078_p10 = por %p3077_p7, %p3076_p4 }
  0x1d   : > { %p3080_p12 = por %p3079_p13, %p3078_p10 }
  0x1f   : > { %p3081_p1 = pnand %p3080_p12, %p3074_p6 }
  0x21   : > { %3084 = shalt.err (!%p3081_p1)
}
  0x22   : > { %s3085_s28 = scalar_lea.vmem %s3300_s8, 1024  ;;  %s3184_s29 = smov [#allocation2]  }
  0x23   : > { %p3086_p2 = scmp.ne.s32.totalorder %s3300_s8, %s3085_s28  ;;  %s3090_s30 = sshll.u32 %s3184_s29, 4  ;;  %s3091_s30 = int_to_ptr.vmem [resolvable:$false] %s3090_s30 }
  0x24   : > { %s3092_s4 = scalar_lea.vmem %s3091_s30, 2048  ;;  %p3093_p9 = scmp.lt.s32.totalorder %s3300_s8, %s3091_s30 }
  0x25   : > { %p3088_p5 = pnand %p3086_p2, %p3072_p3  ;;  %p3094_p4 = scmp.lt.s32.totalorder %s3092_s4, %s3085_s28 }
  0x27   : > { %p3089_p11 = pneg %p3088_p5  ;;  %p3095_p7 = por %p3094_p4, %p3093_p9 }
  0x29   : > { %p3096_p10 = pnand %p3095_p7, %p3089_p11 }
  0x2b   : > { %3099 = shalt.err (!%p3096_p10)
}
  0x2c   : > { %s3185_s5 = smov 512   ;;  %s3186_s7 = smov 32  }
  0x2d   : > { %2991 = dma.hbm_to_vmem [thread:$0]  (!%p3304_p0), %s3298_s6, 1024, %s3300_s8, %s3309_s10, %s3185_s5, %s3185_s5, %s3186_s7  }
  0x2e   : > { %p170_p12 = scmp.lt.s32.totalorder %s3182_s17, 3  ;;  %p3680_p1 = scmp.ge.s32.totalorder %s3182_s17, 1 }
  0x30   : > { %p171_p3 = pnand %p3680_p1, %p170_p12 }
  0x31   : > { %s3341_s11 = sand.u32 (!%p171_p3), 1, %s3166_s13  }
  0x32   : > { %174 = sbr.rel (%p171_p3) target bundleno = 516 (0x204), region = 32  ;;  %s2769_s18 = sshll.u32 (!%p171_p3), %s3341_s11, 6 }
  0x33   : > { %s177_s19 = scalar_lea.sflag (!%p171_p3), [#allocation3], %s3341_s11  ;;  %s3345_s21 = scalar_lea.vmem (!%p171_p3), [#allocation2], %s2769_s18 }
  0x39   : > { %3153 = dma.done.wait (%p3276_p8), %s177_s19, 1024  }
  0x3a   : > { %3155 = vsyncadd (%p3276_p8), %s177_s19, 4294966272  ;;  %v3187_v0 = vmov 0.0   ;;  %vm3188_vm0 = vmmov 0   ;;  %v3358_v1 = vld [vmem:[%s3671_s1] sm:$0xff]  ;;  %v210_v2 = vld [vmem:[%s3345_s21 + $0x10] sm:$0xf0] }
  0x3b   : > { %2879 = vmatprep.subr.mxu1 %v3187_v0  ;;  %294 = vmatprep.mubr.f32.mxu0 %v3187_v0  ;;  %v209_v3 = vld [vmem:[%s3345_s21 + $0x8] sm:$0xf0]  ;;  %vm223_vm1 = vcmask 1043456   ;;  %s3189_s24 = smov 124   ;;  %v219_v4 = vrot.slane %v210_v2, 4  ;;  %s3190_s9 = smov 64  }
  0x3c   : > { %2881 = vmatprep.mubr.msk.f32.mxu1 %vm3188_vm0, %v3187_v0  ;;  %212 = vrot.lane.b32.xlu0 %v3358_v1, %s3189_s24  ;;  %v218_v5 = vrot.slane %v209_v3, 4  ;;  %v208_v6 = vld [vmem:[%s3345_s21] sm:$0xf0]  ;;  %v205_v8 = vld [vmem:[%s3345_s21 + $0x8] sm:$0xf]  ;;  %s3191_s10 = smov 120  }
  0x3d   : > { %v217_v7 = vrot.slane %v208_v6, 4  ;;  %529 = vrot.lane.b32.xlu1 %v219_v4, %s3190_s9  ;;  %2880 = vmatpush3.msk.msra.mxu1 %vm223_vm1, %v219_v4  ;;  %v3375_v9 = vld [vmem:[%s3345_s21 + $0x28] sm:$0xf]  ;;  %s3192_s22 = smov 116   ;;  %v3379_v10 = vld [vmem:[%s3345_s21 + $0x30] sm:$0xf] }
  0x3e   : > { %2770 = vmatprep.subr.msk.mxu0 %vm223_vm1, %v218_v5  ;;  %2884 = vmatprep.subr.mxu1 %v3187_v0  ;;  %s3193_s23 = smov 96   ;;  %v3384_v11 = vld [vmem:[%s3345_s21 + $0x20] sm:$0xf]  ;;  %s3194_s28 = smov 112   ;;  %v1335_v12 = vld [vmem:[%s3345_s21 + $0x28] sm:$0xf0] }
  0x3f   : > { %2771 = vmatpush1.msk.msra.mxu0 %vm223_vm1, %v217_v7  ;;  %s3195_s29 = smov 108   ;;  %s3196_s30 = smov 32   ;;  %v1336_v13 = vld [vmem:[%s3345_s21 + $0x30] sm:$0xf0]  ;;  %v3407_v14 = vrot.slane %v1335_v12, 4  ;;  %v2650_v26 = vld [vmem:[%s3672_s2] sm:$0xff] }
  0x40   : > { %527 = vrot.lane.b32.xlu0 %v218_v5, %s3190_s9  ;;  %2775 = vmatprep.subr.msk.mxu0 %vm223_vm1, %v205_v8  ;;  %s3197_s4 = smov 104   ;;  %v1334_v15 = vld [vmem:[%s3345_s21 + $0x20] sm:$0xf0]  ;;  %s3198_s5 = smov 100   ;;  %v3411_v16 = vrot.slane %v1336_v13, 4  ;;  %v3207_v27 = vmov 0  }
  0x41   : > { %525 = vrot.lane.b32.xlu1 %v217_v7, %s3190_s9  ;;  %v3414_v17 = vrot.slane %v1334_v15, 4  ;;  %s3199_s7 = smov 92   ;;  %s3200_s18 = smov 80   ;;  %v2473_v18 = vld [vmem:[%s3345_s21 + $0x28] sm:$0xf0]  ;;  %3069 = vset.pattern.permute.xlu0 %v3207_v27  ;;  %vm220_vm2 = vcmask 31744  }
  0x42   : > { %s3201_s19 = smov 88   ;;  %s3202_s6 = smov 84   ;;  %v2474_v19 = vld [vmem:[%s3345_s21 + $0x30] sm:$0xf0]  ;;  %v2483_v20 = vrot.slane %v2473_v18, 4  ;;  %vm531_vm3 = vcmask 523264  }
  0x43   : > { %s3203_s8 = smov 48   ;;  %v2475_v21 = vld [vmem:[%s3345_s21 + $0x38] sm:$0xf0]  ;;  %s3204_s24 = smov 76   ;;  %v2484_v22 = vrot.slane %v2474_v19, 4  ;;  %vm854_vm4 = vcmask 785408  }
  0x44   : > { %523 = vrot.lane.b32.xlu0 %v3358_v1, %s3191_s10  ;;  %v2472_v23 = vld [vmem:[%s3345_s21 + $0x20] sm:$0xf0]  ;;  %v2485_v24 = vrot.slane %v2475_v21, 4  ;;  %s3206_s10 = smov 72   ;;  %v204_v28 = vld [vmem:[%s3345_s21] sm:$0xf] }
  0x45   : > { %689 = vrot.lane.b32.xlu1 %v3358_v1, %s3192_s22  ;;  %v2482_v25 = vrot.slane %v2472_v23, 4  ;;  %v206_v29 = vld [vmem:[%s3345_s21 + $0x10] sm:$0xf]  ;;  %vm1179_vm5 = vcmask 261120   ;;  %vm1505_vm6 = vcmask 916480   ;;  %vm1830_vm7 = vcmask 654336  }
  0x46   : > { %vm2155_vm8 = vcmask 392192   ;;  %vm2494_vm9 = vcmask 130048   ;;  %s2982_s21 = smul.u32 24, %s3341_s11  ;;  %vm2661_vm10 = vcmask 138240   ;;  %p3681_p9 = scmp.ne.s32.totalorder %s3677_s25, 0 }
  0x48   : > { %850 = vrot.lane.b32.xlu0 %v3375_v9, %s3193_s23 }
  0x49   : > { %852 = vrot.lane.b32.xlu1 %v3379_v10, %s3193_s23 }
  0x4c   : > { %848 = vrot.lane.b32.xlu0 %v3384_v11, %s3193_s23 }
  0x4d   : > { %846 = vrot.lane.b32.xlu1 %v3358_v1, %s3194_s28 }
  0x50   : > { %1013 = vrot.lane.b32.xlu0 %v3375_v9, %s3190_s9 }
  0x51   : > { %1015 = vrot.lane.b32.xlu1 %v3379_v10, %s3190_s9 }
  0x54   : > { %1011 = vrot.lane.b32.xlu0 %v3384_v11, %s3190_s9 }
  0x55   : > { %1009 = vrot.lane.b32.xlu1 %v3358_v1, %s3195_s29  ;;  %s2983_s29 = smul.u32 384, %s3174_s15  ;;  %s3208_s15 = smov [#allocation5]  }
  0x58   : > { %1175 = vrot.lane.b32.xlu0 %v3375_v9, %s3196_s30 }
  0x59   : > { %1177 = vrot.lane.b32.xlu1 %v3379_v10, %s3196_s30 }
  0x5c   : > { %1173 = vrot.lane.b32.xlu0 %v3384_v11, %s3196_s30 }
  0x5d   : > { %1171 = vrot.lane.b32.xlu1 %v3358_v1, %s3197_s4 }
  0x60   : > { %1337 = vrot.lane.b32.xlu0 %v3358_v1, %s3198_s5 }
  0x61   : > { %1501 = vrot.lane.b32.xlu1 %v3407_v14, %s3194_s28 }
  0x64   : > { %1503 = vrot.lane.b32.xlu0 %v3411_v16, %s3194_s28 }
  0x65   : > { %1499 = vrot.lane.b32.xlu1 %v3414_v17, %s3194_s28  ;;  %s202_s28 = scalar_lea.vmem [#allocation5], %s2982_s21 }
  0x68   : > { %1497 = vrot.lane.b32.xlu0 %v3358_v1, %s3193_s23 }
  0x69   : > { %1664 = vrot.lane.b32.xlu1 %v3407_v14, %s3193_s23 }
  0x6c   : > { %1666 = vrot.lane.b32.xlu0 %v3411_v16, %s3193_s23 }
  0x6d   : > { %1662 = vrot.lane.b32.xlu1 %v3414_v17, %s3193_s23 }
  0x70   : > { %1660 = vrot.lane.b32.xlu0 %v3358_v1, %s3199_s7  ;;  %s3621_s7 = scalar_lea.hbm %s3673_s3, %s2983_s29 }
  0x71   : > { %1826 = vrot.lane.b32.xlu1 %v3407_v14, %s3200_s18 }
  0x74   : > { %1828 = vrot.lane.b32.xlu0 %v3411_v16, %s3200_s18 }
  0x75   : > { %1824 = vrot.lane.b32.xlu1 %v3414_v17, %s3200_s18 }
  0x78   : > { %1822 = vrot.lane.b32.xlu0 %v3358_v1, %s3201_s19 }
  0x79   : > { %1989 = vrot.lane.b32.xlu1 %v3407_v14, %s3190_s9 }
  0x7c   : > { %1991 = vrot.lane.b32.xlu0 %v3411_v16, %s3190_s9 }
  0x7d   : > { %1987 = vrot.lane.b32.xlu1 %v3414_v17, %s3190_s9  ;;  %s3205_s9 = smov 16  }
  0x80   : > { %1985 = vrot.lane.b32.xlu0 %v3358_v1, %s3202_s6  ;;  %s3104_s6 = sshll.u32 %s3208_s15, 4  ;;  %s3105_s6 = int_to_ptr.vmem [resolvable:$false] %s3104_s6 }
  0x81   : > { %2151 = vrot.lane.b32.xlu1 %v3407_v14, %s3203_s8 }
  0x84   : > { %2153 = vrot.lane.b32.xlu0 %v3411_v16, %s3203_s8 }
  0x85   : > { %2149 = vrot.lane.b32.xlu1 %v3414_v17, %s3203_s8  ;;  %s3106_s8 = scalar_lea.vmem %s3105_s6, 768 }
  0x88   : > { %2147 = vrot.lane.b32.xlu0 %v3358_v1, %s3200_s18  ;;  %s2664_s18 = scalar_lea.sflag [#allocation4], %s3341_s11 }
  0x89   : > { %2314 = vrot.lane.b32.xlu1 %v3407_v14, %s3196_s30 }
  0x8c   : > { %2316 = vrot.lane.b32.xlu0 %v3411_v16, %s3196_s30 }
  0x8d   : > { %2312 = vrot.lane.b32.xlu1 %v3414_v17, %s3196_s30  ;;  %s2680_s30 = sshll.u32 %s202_s28, 4  ;;  %s3623_s30 = int_to_ptr.vmem [resolvable:$true] %s2680_s30 }
  0x8e   : > { %s3100_s19 = scalar_lea.vmem %s3623_s30, 384  ;;  %p3107_p6 = scmp.lt.s32.totalorder %s3623_s30, %s3105_s6 }
  0x8f   : > { %p3101_p8 = scmp.ne.s32.totalorder %s3623_s30, %s3100_s19  ;;  %p3108_p13 = scmp.lt.s32.totalorder %s3106_s8, %s3100_s19 }
  0x90   : > { %2310 = vrot.lane.b32.xlu0 %v3358_v1, %s3204_s24 }
  0x91   : > { %2488 = vrot.lane.b32.xlu1 %v2483_v20, %s3205_s9  ;;  %p3102_p11 = pnand %p3101_p8, %p3681_p9  ;;  %p3109_p2 = por %p3108_p13, %p3107_p6 }
  0x93   : > { %p3103_p0 = pneg %p3102_p11 }
  0x94   : > { %2490 = vrot.lane.b32.xlu0 %v2484_v22, %s3205_s9 }
  0x95   : > { %2492 = vrot.lane.b32.xlu1 %v2485_v24, %s3205_s9  ;;  %p3110_p5 = pnand %p3109_p2, %p3103_p0 }
  0x98   : > { %2486 = vrot.lane.b32.xlu0 %v2482_v25, %s3205_s9 }
  0x99   : > { %2476 = vrot.lane.b32.xlu1 %v3358_v1, %s3206_s10 }
  0x9c   : > { %2653 = vperm.xlu0 %3069, %v2650_v26  }
  0xae   : > { %v213_v30 = vpop.permute.xlu0 %212 }
  0xaf   : > { %2772 = vmatmul.mubr.msk.f32.vlgmr.msra.gmra.mrb[0].mxu0 %vm220_vm2, %v213_v30  ;;  %2882 = vmatmul.mubr.msk.f32.vlgmr.msra.gmra.mrb[0].mxu1 %vm220_vm2, %v213_v30  ;;  %v530_v31 = vpop.permute.xlu1 %529 }
  0xb0   : > { %2776 = vmatpush1.msk.msra.mxu0 %vm223_vm1, %v204_v28  ;;  %2885 = vmatpush3.msk.msra.mxu1 %vm223_vm1, %v206_v29 }
  0xb1   : > { %2886 = vmatprep.mubr.msk.f32.mxu1 %vm3188_vm0, %v3187_v0  ;;  %2889 = vmatprep.subr.mxu1 %v3187_v0 }
  0xb2   : > { %v528_v32 = vpop.permute.xlu0 %527  ;;  %446 = vmatprep.mubr.f32.mxu0 %v3187_v0 }
  0xb3   : > { %v533_v33 = vsel %vm531_vm3, %v528_v32, %v530_v31  ;;  %2887 = vmatmul.mubr.msk.f32.vlgmr.msra.gmra.mrb[2].mxu1 %vm220_vm2, %v3358_v1  ;;  %v526_v34 = vpop.permute.xlu1 %525 }
  0xb4   : > { %2890 = vmatpush3.msk.msra.mxu1 %vm223_vm1, %v530_v31  ;;  %2780 = vmatprep.subr.msk.mxu0 %vm223_vm1, %v533_v33  ;;  %v532_v35 = vsel %vm531_vm3, %v526_v34, %v528_v32 }
  0xb5   : > { %2891 = vmatprep.mubr.msk.f32.mxu1 %vm3188_vm0, %v3187_v0  ;;  %2894 = vmatprep.subr.mxu1 %v3187_v0 }
  0xb6   : > { %v524_v36 = vpop.permute.xlu0 %523 }
  0xb7   : > { %2777 = vmatmul.mubr.msk.f32.vlgmr.msra.gmra.mrb[0].mxu0 %vm220_vm2, %v3358_v1  ;;  %2892 = vmatmul.mubr.msk.f32.vlgmr.msra.gmra.mrb[4].mxu1 %vm220_vm2, %v524_v36  ;;  %v690_v37 = vpop.permute.xlu1 %689 }
  0xb8   : > { %2781 = vmatpush1.msk.msra.mxu0 %vm223_vm1, %v532_v35  ;;  %2895 = vmatpush3.msk.msra.mxu1 %vm223_vm1, %v3379_v10 }
  0xb9   : > { %2896 = vmatprep.mubr.msk.f32.mxu1 %vm3188_vm0, %v3187_v0  ;;  %606 = vmatprep.mubr.f32.mxu0 %v3187_v0 }
  0xba   : > { %v851_v38 = vpop.permute.xlu0 %850  ;;  %2785 = vmatprep.subr.msk.mxu0 %vm223_vm1, %v3375_v9  ;;  %2899 = vmatprep.subr.mxu1 %v3187_v0 }
  0xbb   : > { %2897 = vmatmul.mubr.msk.f32.vlgmr.msra.gmra.mrb[6].mxu1 %vm220_vm2, %v690_v37  ;;  %v853_v39 = vpop.permute.xlu1 %852 }
  0xbc   : > { %2901 = vmatprep.mubr.msk.f32.mxu1 %vm3188_vm0, %v3187_v0  ;;  %2900 = vmatpush3.msk.msra.mxu1 %vm223_vm1, %v853_v39  ;;  %v856_v40 = vsel %vm854_vm4, %v851_v38, %v853_v39 }
  0xbd   : > { %2904 = vmatprep.subr.mxu1 %v3187_v0 }
  0xbe   : > { %v849_v41 = vpop.permute.xlu0 %848 }
  0xbf   : > { %2782 = vmatmul.mubr.msk.f32.vlgmr.msra.gmra.mrb[0].mxu0 %vm220_vm2, %v524_v36  ;;  %v847_v42 = vpop.permute.xlu1 %846  ;;  %v855_v45 = vsel %vm854_vm4, %v849_v41, %v851_v38 }
  0xc0   : > { %2786 = vmatpush1.msk.msra.mxu0 %vm223_vm1, %v3384_v11  ;;  %766 = vmatprep.mubr.f32.mxu0 %v3187_v0 }
  0xc1   : > { %2902 = vmatmul.mubr.msk.f32.vlgmr.msra.gmra.mrb[8].mxu1 %vm220_vm2, %v847_v42  ;;  %2790 = vmatprep.subr.msk.mxu0 %vm223_vm1, %v856_v40 }
  0xc2   : > { %v1014_v43 = vpop.permute.xlu0 %1013  ;;  %2906 = vmatprep.mubr.msk.f32.mxu1 %vm3188_vm0, %v3187_v0 }
  0xc3   : > { %v1016_v44 = vpop.permute.xlu1 %1015 }
  0xc4   : > { %2905 = vmatpush3.msk.msra.mxu1 %vm223_vm1, %v1016_v44  ;;  %v1018_v46 = vsel %vm531_vm3, %v1014_v43, %v1016_v44 }
  0xc5   : > { %2909 = vmatprep.subr.mxu1 %v3187_v0 }
  0xc6   : > { %v1012_v47 = vpop.permute.xlu0 %1011 }
  0xc7   : > { %2787 = vmatmul.mubr.msk.f32.vlgmr.msra.gmra.mrb[0].mxu0 %vm220_vm2, %v690_v37  ;;  %v1010_v48 = vpop.permute.xlu1 %1009  ;;  %v1017_v51 = vsel %vm531_vm3, %v1012_v47, %v1014_v43 }
  0xc8   : > { %2791 = vmatpush1.msk.msra.mxu0 %vm223_vm1, %v855_v45  ;;  %929 = vmatprep.mubr.f32.mxu0 %v3187_v0 }
  0xc9   : > { %2907 = vmatmul.mubr.msk.f32.vlgmr.msra.gmra.mrb[10].mxu1 %vm220_vm2, %v1010_v48  ;;  %2795 = vmatprep.subr.msk.mxu0 %vm223_vm1, %v1018_v46 }
  0xca   : > { %v1176_v49 = vpop.permute.xlu0 %1175  ;;  %2911 = vmatprep.mubr.msk.f32.mxu1 %vm3188_vm0, %v3187_v0 }
  0xcb   : > { %v1178_v50 = vpop.permute.xlu1 %1177 }
  0xcc   : > { %2910 = vmatpush3.msk.msra.mxu1 %vm223_vm1, %v1178_v50  ;;  %v1181_v52 = vsel %vm1179_vm5, %v1176_v49, %v1178_v50 }
  0xcd   : > { %2914 = vmatprep.subr.mxu1 %v3187_v0 }
  0xce   : > { %v1174_v53 = vpop.permute.xlu0 %1173 }
  0xcf   : > { %2792 = vmatmul.mubr.msk.f32.vlgmr.msra.gmra.mrb[0].mxu0 %vm220_vm2, %v847_v42  ;;  %v1172_v54 = vpop.permute.xlu1 %1171  ;;  %v1180_v57 = vsel %vm1179_vm5, %v1174_v53, %v1176_v49 }
  0xd0   : > { %2796 = vmatpush1.msk.msra.mxu0 %vm223_vm1, %v1017_v51  ;;  %1091 = vmatprep.mubr.f32.mxu0 %v3187_v0 }
  0xd1   : > { %2912 = vmatmul.mubr.msk.f32.vlgmr.msra.gmra.mrb[12].mxu1 %vm220_vm2, %v1172_v54  ;;  %2800 = vmatprep.subr.msk.mxu0 %vm223_vm1, %v1181_v52 }
  0xd2   : > { %v1338_v55 = vpop.permute.xlu0 %1337  ;;  %2915 = vmatpush3.msk.msra.mxu1 %vm223_vm1, %v3411_v16  ;;  %2916 = vmatprep.mubr.msk.f32.mxu1 %vm3188_vm0, %v3187_v0 }
  0xd3   : > { %2919 = vmatprep.subr.mxu1 %v3187_v0  ;;  %v1502_v56 = vpop.permute.xlu1 %1501 }
  0xd5   : > { %2917 = vmatmul.mubr.msk.f32.vlgmr.msra.gmra.mrb[14].mxu1 %vm220_vm2, %v1338_v55 }
  0xd6   : > { %v1504_v58 = vpop.permute.xlu0 %1503  ;;  %2921 = vmatprep.mubr.msk.f32.mxu1 %vm3188_vm0, %v3187_v0 }
  0xd7   : > { %2797 = vmatmul.mubr.msk.f32.vlgmr.msra.gmra.mrb[0].mxu0 %vm220_vm2, %v1010_v48  ;;  %2920 = vmatpush3.msk.msra.mxu1 %vm223_vm1, %v1504_v58  ;;  %v1500_v59 = vpop.permute.xlu1 %1499  ;;  %v1507_v62 = vsel %vm1505_vm6, %v1502_v56, %v1504_v58 }
  0xd8   : > { %2801 = vmatpush1.msk.msra.mxu0 %vm223_vm1, %v1180_v57  ;;  %1254 = vmatprep.mubr.f32.mxu0 %v3187_v0  ;;  %v1506_v4 = vsel %vm1505_vm6, %v1500_v59, %v1502_v56 }
  0xd9   : > { %2805 = vmatprep.subr.msk.mxu0 %vm223_vm1, %v3407_v14  ;;  %2924 = vmatprep.subr.mxu1 %v3187_v0 }
  0xda   : > { %v1498_v60 = vpop.permute.xlu0 %1497 }
  0xdb   : > { %2922 = vmatmul.mubr.msk.f32.vlgmr.msra.gmra.mrb[16].mxu1 %vm220_vm2, %v1498_v60  ;;  %v1665_v61 = vpop.permute.xlu1 %1664 }
  0xdc   : > { %2926 = vmatprep.mubr.msk.f32.mxu1 %vm3188_vm0, %v3187_v0 }
  0xde   : > { %v1667_v63 = vpop.permute.xlu0 %1666 }
  0xdf   : > { %2802 = vmatmul.mubr.msk.f32.vlgmr.msra.gmra.mrb[0].mxu0 %vm220_vm2, %v1172_v54  ;;  %2925 = vmatpush3.msk.msra.mxu1 %vm223_vm1, %v1667_v63  ;;  %v1663_v1 = vpop.permute.xlu1 %1662  ;;  %v1669_v5 = vsel %vm854_vm4, %v1665_v61, %v1667_v63 }
  0xe0   : > { %2806 = vmatpush1.msk.msra.mxu0 %vm223_vm1, %v3414_v17  ;;  %1417 = vmatprep.mubr.f32.mxu0 %v3187_v0  ;;  %v1668_v10 = vsel %vm854_vm4, %v1663_v1, %v1665_v61 }
  0xe1   : > { %2810 = vmatprep.subr.msk.mxu0 %vm223_vm1, %v1507_v62  ;;  %2929 = vmatprep.subr.mxu1 %v3187_v0 }
  0xe2   : > { %v1661_v2 = vpop.permute.xlu0 %1660 }
  0xe3   : > { %2927 = vmatmul.mubr.msk.f32.vlgmr.msra.gmra.mrb[18].mxu1 %vm220_vm2, %v1661_v2  ;;  %v1827_v3 = vpop.permute.xlu1 %1826 }
  0xe4   : > { %2931 = vmatprep.mubr.msk.f32.mxu1 %vm3188_vm0, %v3187_v0 }
  0xe6   : > { %v1829_v6 = vpop.permute.xlu0 %1828 }
  0xe7   : > { %2807 = vmatmul.mubr.msk.f32.vlgmr.msra.gmra.mrb[0].mxu0 %vm220_vm2, %v1338_v55  ;;  %2930 = vmatpush3.msk.msra.mxu1 %vm223_vm1, %v1829_v6  ;;  %v1825_v7 = vpop.permute.xlu1 %1824  ;;  %v1832_v11 = vsel %vm1830_vm7, %v1827_v3, %v1829_v6 }
  0xe8   : > { %2811 = vmatpush1.msk.msra.mxu0 %vm223_vm1, %v1506_v4  ;;  %1580 = vmatprep.mubr.f32.mxu0 %v3187_v0  ;;  %v1831_v16 = vsel %vm1830_vm7, %v1825_v7, %v1827_v3 }
  0xe9   : > { %2815 = vmatprep.subr.msk.mxu0 %vm223_vm1, %v1669_v5  ;;  %2934 = vmatprep.subr.mxu1 %v3187_v0 }
  0xea   : > { %v1823_v8 = vpop.permute.xlu0 %1822 }
  0xeb   : > { %2932 = vmatmul.mubr.msk.f32.vlgmr.msra.gmra.mrb[20].mxu1 %vm220_vm2, %v1823_v8  ;;  %v1990_v9 = vpop.permute.xlu1 %1989 }
  0xec   : > { %2936 = vmatprep.mubr.msk.f32.mxu1 %vm3188_vm0, %v3187_v0 }
  0xee   : > { %v1992_v12 = vpop.permute.xlu0 %1991 }
  0xef   : > { %2812 = vmatmul.mubr.msk.f32.vlgmr.msra.gmra.mrb[0].mxu0 %vm220_vm2, %v1498_v60  ;;  %2935 = vmatpush3.msk.msra.mxu1 %vm223_vm1, %v1992_v12  ;;  %v1988_v13 = vpop.permute.xlu1 %1987  ;;  %v1994_v17 = vsel %vm531_vm3, %v1990_v9, %v1992_v12 }
  0xf0   : > { %2816 = vmatpush1.msk.msra.mxu0 %vm223_vm1, %v1668_v10  ;;  %1742 = vmatprep.mubr.f32.mxu0 %v3187_v0  ;;  %v1993_v22 = vsel %vm531_vm3, %v1988_v13, %v1990_v9 }
  0xf1   : > { %2820 = vmatprep.subr.msk.mxu0 %vm223_vm1, %v1832_v11  ;;  %2939 = vmatprep.subr.mxu1 %v3187_v0 }
  0xf2   : > { %v1986_v14 = vpop.permute.xlu0 %1985 }
  0xf3   : > { %2937 = vmatmul.mubr.msk.f32.vlgmr.msra.gmra.mrb[22].mxu1 %vm220_vm2, %v1986_v14  ;;  %v2152_v15 = vpop.permute.xlu1 %2151 }
  0xf4   : > { %2941 = vmatprep.mubr.msk.f32.mxu1 %vm3188_vm0, %v3187_v0 }
  0xf6   : > { %v2154_v18 = vpop.permute.xlu0 %2153 }
  0xf7   : > { %2817 = vmatmul.mubr.msk.f32.vlgmr.msra.gmra.mrb[0].mxu0 %vm220_vm2, %v1661_v2  ;;  %2940 = vmatpush3.msk.msra.mxu1 %vm223_vm1, %v2154_v18  ;;  %v2150_v19 = vpop.permute.xlu1 %2149  ;;  %v2157_v23 = vsel %vm2155_vm8, %v2152_v15, %v2154_v18 }
  0xf8   : > { %2821 = vmatpush1.msk.msra.mxu0 %vm223_vm1, %v1831_v16  ;;  %1905 = vmatprep.mubr.f32.mxu0 %v3187_v0  ;;  %v2156_v28 = vsel %vm2155_vm8, %v2150_v19, %v2152_v15 }
  0xf9   : > { %2825 = vmatprep.subr.msk.mxu0 %vm223_vm1, %v1994_v17  ;;  %2944 = vmatprep.subr.mxu1 %v3187_v0 }
  0xfa   : > { %v2148_v20 = vpop.permute.xlu0 %2147 }
  0xfb   : > { %2942 = vmatmul.mubr.msk.f32.vlgmr.msra.gmra.mrb[24].mxu1 %vm220_vm2, %v2148_v20  ;;  %v2315_v21 = vpop.permute.xlu1 %2314 }
  0xfc   : > { %2946 = vmatprep.mubr.msk.f32.mxu1 %vm3188_vm0, %v3187_v0 }
  0xfe   : > { %v2317_v24 = vpop.permute.xlu0 %2316 }
  0xff   : > { %2822 = vmatmul.mubr.msk.f32.vlgmr.msra.gmra.mrb[0].mxu0 %vm220_vm2, %v1823_v8  ;;  %2945 = vmatpush3.msk.msra.mxu1 %vm223_vm1, %v2317_v24  ;;  %v2313_v25 = vpop.permute.xlu1 %2312  ;;  %v2319_v29 = vsel %vm1179_vm5, %v2315_v21, %v2317_v24 }
 0x100   : > { %2826 = vmatpush1.msk.msra.mxu0 %vm223_vm1, %v1993_v22  ;;  %2067 = vmatprep.mubr.f32.mxu0 %v3187_v0  ;;  %v2318_v34 = vsel %vm1179_vm5, %v2313_v25, %v2315_v21 }
 0x101   : > { %2830 = vmatprep.subr.msk.mxu0 %vm223_vm1, %v2157_v23  ;;  %2949 = vmatprep.subr.mxu1 %v3187_v0 }
 0x102   : > { %v2311_v26 = vpop.permute.xlu0 %2310 }
 0x103   : > { %2947 = vmatmul.mubr.msk.f32.vlgmr.msra.gmra.mrb[26].mxu1 %vm220_vm2, %v2311_v26  ;;  %v2489_v27 = vpop.permute.xlu1 %2488 }
 0x104   : > { %2951 = vmatprep.mubr.msk.f32.mxu1 %vm3188_vm0, %v3187_v0 }
 0x106   : > { %v2491_v30 = vpop.permute.xlu0 %2490 }
 0x107   : > { %2827 = vmatmul.mubr.msk.f32.vlgmr.msra.gmra.mrb[0].mxu0 %vm220_vm2, %v1986_v14  ;;  %v2493_v31 = vpop.permute.xlu1 %2492  ;;  %v2496_v35 = vsel %vm2494_vm9, %v2489_v27, %v2491_v30 }
 0x108   : > { %2831 = vmatpush1.msk.msra.mxu0 %vm223_vm1, %v2156_v28  ;;  %2230 = vmatprep.mubr.f32.mxu0 %v3187_v0  ;;  %v2497_v32 = vsel %vm2494_vm9, %v2491_v30, %v2493_v31 }
 0x109   : > { %2835 = vmatprep.subr.msk.mxu0 %vm223_vm1, %v2319_v29  ;;  %2950 = vmatpush3.msk.msra.mxu1 %vm223_vm1, %v2497_v32 }
 0x10a   : > { %v2487_v36 = vpop.permute.xlu0 %2486 }
 0x10b   : > { %v2477_v33 = vpop.permute.xlu1 %2476  ;;  %v2495_v37 = vsel %vm2494_vm9, %v2487_v36, %v2489_v27 }
 0x10c   : > { %2952 = vmatmul.mubr.msk.f32.vlgmr.msra.gmra.mrb[28].mxu1 %vm220_vm2, %v2477_v33 }
 0x10f   : > { %2832 = vmatmul.mubr.msk.f32.vlgmr.msra.gmra.mrb[0].mxu0 %vm220_vm2, %v2148_v20 }
 0x110   : > { %2836 = vmatpush1.msk.msra.mxu0 %vm223_vm1, %v2318_v34  ;;  %2392 = vmatprep.mubr.f32.mxu0 %v3187_v0 }
 0x111   : > { %2840 = vmatprep.subr.msk.mxu0 %vm223_vm1, %v2496_v35 }
 0x117   : > { %2837 = vmatmul.mubr.msk.f32.vlgmr.msra.gmra.mrb[0].mxu0 %vm220_vm2, %v2311_v26 }
 0x118   : > { %2841 = vmatpush1.msk.msra.mxu0 %vm223_vm1, %v2495_v37  ;;  %2570 = vmatprep.mubr.f32.mxu0 %v3187_v0 }
 0x11b   : > { %v2654_v16 = vpop.permute.xlu0 %2653 }
 0x11f   : > { %2842 = vmatmul.mubr.msk.f32.vlgmr.msra.gmra.mrb[0].mxu0 %vm220_vm2, %v2477_v33 }
 0x182   : > { %v367_v38 = vpop.f32.mrb[0].mxu1 }
 0x183   : > { %v2883_v39 = vpop.f32.mrb[1].mxu1 }
 0x186   : > { %v519_v40 = vpop.f32.mrb[2].mxu1 }
 0x187   : > { %v520_v41 = vadd.f32 %v519_v40, %v367_v38  ;;  %v2888_v42 = vpop.f32.mrb[3].mxu1 }
 0x18a   : > { %v679_v43 = vpop.f32.mrb[4].mxu1 }
 0x18b   : > { %v685_v44 = vadd.f32 %v679_v43, %v520_v41  ;;  %v2893_v45 = vpop.f32.mrb[5].mxu1 }
 0x18e   : > { %v839_v46 = vpop.f32.mrb[6].mxu1 }
 0x18f   : > { %v845_v47 = vadd.f32 %v839_v46, %v685_v44  ;;  %v2898_v48 = vpop.f32.mrb[7].mxu1 }
 0x194   : > { %v1002_v49 = vpop.f32.mrb[8].mxu1 }
 0x195   : > { %v1008_v50 = vadd.f32 %v1002_v49, %v845_v47  ;;  %v2903_v51 = vpop.f32.mrb[9].mxu1 }
 0x19c   : > { %v1164_v52 = vpop.f32.mrb[10].mxu1 }
 0x19d   : > { %v1170_v53 = vadd.f32 %v1164_v52, %v1008_v50  ;;  %v2908_v54 = vpop.f32.mrb[11].mxu1 }
 0x1a4   : > { %v1327_v0 = vpop.f32.mrb[12].mxu1 }
 0x1a5   : > { %v1333_v55 = vadd.f32 %v1327_v0, %v1170_v53  ;;  %v2913_v56 = vpop.f32.mrb[13].mxu1 }
 0x1a8   : > { %v1490_v57 = vpop.f32.mrb[14].mxu1 }
 0x1a9   : > { %v1496_v58 = vadd.f32 %v1490_v57, %v1333_v55  ;;  %v2918_v59 = vpop.f32.mrb[15].mxu1 }
 0x1ae   : > { %v1653_v60 = vpop.f32.mrb[16].mxu1 }
 0x1af   : > { %v1659_v61 = vadd.f32 %v1653_v60, %v1496_v58  ;;  %v2923_v62 = vpop.f32.mrb[17].mxu1 }
 0x1b6   : > { %v1815_v63 = vpop.f32.mrb[18].mxu1 }
 0x1b7   : > { %v1821_v1 = vadd.f32 %v1815_v63, %v1659_v61  ;;  %v2928_v2 = vpop.f32.mrb[19].mxu1 }
 0x1be   : > { %v1978_v3 = vpop.f32.mrb[20].mxu1 }
 0x1bf   : > { %v1984_v4 = vadd.f32 %v1978_v3, %v1821_v1  ;;  %v2933_v5 = vpop.f32.mrb[21].mxu1 }
 0x1c6   : > { %v2140_v6 = vpop.f32.mrb[22].mxu1 }
 0x1c7   : > { %v2146_v7 = vadd.f32 %v2140_v6, %v1984_v4  ;;  %v2938_v8 = vpop.f32.mrb[23].mxu1 }
 0x1ce   : > { %v2303_v9 = vpop.f32.mrb[24].mxu1 }
 0x1cf   : > { %v2309_v10 = vadd.f32 %v2303_v9, %v2146_v7  ;;  %v2943_v11 = vpop.f32.mrb[25].mxu1 }
 0x1d6   : > { %v2465_v12 = vpop.f32.mrb[26].mxu1 }
 0x1d7   : > { %v2471_v13 = vadd.f32 %v2465_v12, %v2309_v10  ;;  %v2948_v14 = vpop.f32.mrb[27].mxu1 }
 0x1df   : > { %v2643_v15 = vpop.f32.mrb[28].mxu1 }
 0x1e0   : > { %v2649_v17 = vadd.f32 %v2643_v15, %v2471_v13  ;;  %v2953_v18 = vpop.f32.mrb[29].mxu1 }
 0x1e2   : > { %v2658_v19 = vadd.f32 %v2654_v16, %v2649_v17 }
 0x1e4   : > { %2662 = vst.msk [vmem:[%s202_s28 + $0x10] sm:$0xff] %vm2661_vm10, %v2658_v19 }
 0x1f2   : > { %v2572_v20 = vpop.f32.mrb[0].mxu0 }
 0x1f3   : > { %v2656_v21 = vadd.f32 %v2654_v16, %v2572_v20  ;;  %v2574_v22 = vpop.f32.mrb[1].mxu0 }
 0x1f4   : > { %v2657_v23 = vadd.f32 %v2654_v16, %v2574_v22 }
 0x1f5   : > { %2659 = vst [vmem:[%s202_s28] sm:$0xff] %v2656_v21 }
 0x1f6   : > { %2660 = vst [vmem:[%s202_s28 + $0x8] sm:$0xff] %v2657_v23 }
 0x1f7   : > { %3113 = shalt.err (!%p3110_p5)
}
 0x1f8   : > { %s3114_s11 = scalar_lea.hbm %s3621_s7, 384  ;;  %s3118_s10 = scalar_lea.hbm %s3673_s3, 768 }
 0x1f9   : > { %p3115_p4 = scmp.ne.s32.totalorder %s3621_s7, %s3114_s11  ;;  %p3119_p12 = scmp.lt.u32.totalorder %s3621_s7, %s3673_s3 }
 0x1fa   : > { %p3120_p1 = scmp.lt.u32.totalorder %s3118_s10, %s3114_s11  ;;  %p3122_p8 = scmp.lt.u32.totalorder %s3114_s11, %s3621_s7 }
 0x1fb   : > { %p3116_p7 = pnand %p3115_p4, %p3681_p9 }
 0x1fc   : > { %p3121_p3 = por %p3120_p1, %p3119_p12 }
 0x1fd   : > { %p3117_p10 = pneg %p3116_p7 }
 0x1fe   : > { %p3123_p11 = por %p3122_p8, %p3121_p3 }
 0x200   : > { %p3124_p0 = pnand %p3123_p11, %p3117_p10 }
 0x202   : > { %3127 = shalt.err (!%p3124_p0)
}
 0x203   : > { %2986 = dma.vmem_to_hbm [thread:$0]  (%p3681_p9), %s3623_s30, 384, %s3621_s7, %s2664_s18  }
 0x204 PF: > { %s2692_s21 = sand.u32 1, %s3162_s12   ;;  %p3682_p6 = scmp.ne.s32.totalorder %s3678_s27, 0 }
 0x205   : > { %p3683_p13 = scmp.ge.s32.totalorder %s3182_s17, 2  ;;  %s2693_s28 = scalar_lea.sflag [#allocation4], %s2692_s21 }
 0x207   : > { %p2993_p2 = pnand %p3683_p13, %p3682_p6 }
 0x209   : > { %3157 = dma.done.wait (!%p2993_p2), %s2693_s28, 384  }
 0x20a   : > { %3159 = vsyncadd (!%p2993_p2), %s2693_s28, 4294966912  ;;  %s19_s17 = sadd.s32 1, %s3182_s17   ;;  %s3684_s12 = smov %s3166_s13 }
 0x20b   : > { %p16_p5 = scmp.ge.s32.totalorder %s19_s17, 4   ;;  %s3685_s13 = smov %s3170_s14 }
 0x20c   : > { %s3686_s14 = smov %s3285_s26  ;;  %s3687_s15 = smov %s3178_s16 }
 0x20d   : > { %s3688_s16 = smov %s3690_s20  ;;  %18 = sbr.rel (!%p16_p5) target bundleno = 6 (0x6), region = 77 }
 0x214   :  { %2698 = vsyncpa [#allocation3], 1 }
 0x215   :  { %2700 = vsyncpa [#allocation3 + $0x1], 1 }
 0x216   :  { %2701 = vsyncpa [#allocation4], 1 }
 0x217   :  { %2703 = vsyncpa [#allocation4 + $0x1], 1 }

</bundles_post_ra>
